<compile_context>
chip_gen: v7x
topology: tpu7x:2x2x1
jax: 0.10.0
libtpu: 0.0.40
codegen_flags: <defaults>
</compile_context>

<pallas_src>
import math
import numpy as np
import jax
import jax.numpy as jnp
from jax.experimental import pallas as pl
from jax.experimental.pallas import tpu as pltpu

# ----------------------------- configuration -----------------------------
SEQ_LEN    = 16
LABEL_LEN  = 8
PRED_LEN   = 8
ENC_IN     = 4
C_OUT      = 4
D_MODEL    = 32
N_HEADS    = 8
D_FF       = 64
MODES      = 8
MOVING_AVG = 5
MARK_DIM   = 4            # embed='timeF', freq='h' -> 4 time features
E_LAYERS   = 1
D_LAYERS   = 1
EPS_REVIN  = 1e-5
EPS_LN     = 1e-5
DEC_LEN    = LABEL_LEN + PRED_LEN

F32  = jnp.float32
VMEM = pl.BlockSpec(memory_space=pltpu.MemorySpace.VMEM)


def get_frequency_modes(seq_len, modes, mode_select_method='low'):
    modes = min(modes, seq_len // 2)
    return list(range(0, modes))          # 'low' -> contiguous modes 0..modes-1


# ----------------------------- static helper matrices -----------------------------
def _moving_avg_matrix(L, k):
    """A[t, s]: weight of x[s] in the edge-replicated moving average at time t."""
    pad = (k - 1) // 2
    A = np.zeros((L, L), np.float32)
    for t in range(L):
        for i in range(k):
            s = min(max(t + i - pad, 0), L - 1)
            A[t, s] += 1.0 / k
    return A


def _time_mean_matrix(L):
    return np.full((L, L), 1.0 / L, np.float32)


def _circ_shift_matrix(L, shift):
    """(P @ x)[t] = x[(t + shift) % L]."""
    P = np.zeros((L, L), np.float32)
    for t in range(L):
        P[t, (t + shift) % L] = 1.0
    return P


def _block_diag(A, nblocks):
    L = A.shape[0]
    out = np.zeros((nblocks * L, nblocks * L), np.float32)
    for b in range(nblocks):
        out[b * L:(b + 1) * L, b * L:(b + 1) * L] = A
    return out


def positional_encoding(max_len, d_model):
    pos = np.arange(max_len, dtype=np.float32)[:, None]
    div = np.exp(np.arange(0, d_model, 2, dtype=np.float32)
                 * -(math.log(10000.0) / d_model))
    pe = np.zeros((max_len, d_model), np.float32)
    pe[:, 0::2] = np.sin(pos * div)
    pe[:, 1::2] = np.cos(pos * div)
    return jnp.asarray(pe)


# ----------------------------- in-kernel helpers -----------------------------
def _dot(a, b):
    return jnp.dot(a, b, preferred_element_type=F32)


def _layernorm_time(x, g, b, tmean):
    """my_Layernorm: LayerNorm over channels, then subtract per-sequence time mean."""
    mu = jnp.mean(x, axis=-1, keepdims=True)
    var = jnp.mean(jnp.square(x - mu), axis=-1, keepdims=True)
    xh = (x - mu) * jax.lax.rsqrt(var + EPS_LN) * g + b
    return xh - _dot(tmean, xh)


def _enc_chain(x, a, wo, bo, ma, w1, w2):
    """out proj + residual + decomp1 + FFN residual + decomp2 (seasonal only)."""
    x = x + _dot(a, wo) + bo
    x = x - _dot(ma, x)                                   # series_decomp #1
    y = _dot(jnp.maximum(_dot(x, w1), 0.0), w2)           # relu 1x1-conv FFN
    z = x + y
    return z - _dot(ma, z)                                # series_decomp #2


def _dec_chain(xs, a, wo, bo, ma, w1, w2):
    """cross out proj + residual + decomp2 + FFN residual + decomp3 (keep trends)."""
    x = xs + _dot(a, wo) + bo
    t2 = _dot(ma, x)
    x = x - t2
    y = _dot(jnp.maximum(_dot(x, w1), 0.0), w2)
    z = x + y
    t3 = _dot(ma, z)
    return z - t3, t2, t3


def _trend_proj(rt, pprev, pnext, wm1, w0, wp1):
    """Circular Conv1d(d_model -> c_out, k=3, bias=False) on the trend."""
    return (_dot(_dot(pprev, rt), wm1) + _dot(rt, w0) + _dot(_dot(pnext, rt), wp1))


# ----------------------------- Pallas kernels -----------------------------
def _embed_q_kernel(x_ref, mark_ref, pe_ref, pprev_ref, pnext_ref,
                    wm1_ref, w0_ref, wp1_ref, wt_ref, wq_ref, bq_ref,
                    emb_ref, q_ref):
    """DataEmbedding (circular-conv3 token emb + temporal emb + pos emb) fused with
    the first self-attention Q projection."""
    x = x_ref[...]                                        # [M, Cin]
    xm1 = _dot(pprev_ref[...], x)                         # x(t-1), circular
    xp1 = _dot(pnext_ref[...], x)                         # x(t+1), circular
    emb = (_dot(xm1, wm1_ref[...]) + _dot(x, w0_ref[...]) + _dot(xp1, wp1_ref[...])
           + _dot(mark_ref[...], wt_ref[...]) + pe_ref[...])
    emb_ref[...] = emb
    q_ref[...] = _dot(emb, wq_ref[...]) + bq_ref[...]


def embed_and_q(x_flat, mark_flat, pe_flat, pprev, pnext, emb_p, wq, bq):
    M = x_flat.shape[0]
    return pl.pallas_call(
        _embed_q_kernel,
        out_shape=(jax.ShapeDtypeStruct((M, D_MODEL), F32),
                   jax.ShapeDtypeStruct((M, D_MODEL), F32)),
        in_specs=[VMEM] * 11,
        out_specs=(VMEM, VMEM),
    )(x_flat, mark_flat, pe_flat, pprev, pnext,
      emb_p['token_wm1'], emb_p['token_w0'], emb_p['token_wp1'],
      emb_p['temporal_w'], wq, bq)


def _make_enc_post_kernel(is_last):
    if is_last:
        def kernel(x_ref, a_ref, ma_ref, wo_ref, bo_ref, w1_ref, w2_ref,
                   g_ref, b_ref, tmean_ref, o_ref):
            res = _enc_chain(x_ref[...], a_ref[...], wo_ref[...], bo_ref[...],
                             ma_ref[...], w1_ref[...], w2_ref[...])
            o_ref[...] = _layernorm_time(res, g_ref[...], b_ref[...], tmean_ref[...])
    else:
        def kernel(x_ref, a_ref, ma_ref, wo_ref, bo_ref, w1_ref, w2_ref,
                   wqn_ref, bqn_ref, o_ref, q_ref):
            res = _enc_chain(x_ref[...], a_ref[...], wo_ref[...], bo_ref[...],
                             ma_ref[...], w1_ref[...], w2_ref[...])
            o_ref[...] = res
            q_ref[...] = _dot(res, wqn_ref[...]) + bqn_ref[...]
    return kernel


def enc_post_last(x, attn, lp, ma, norm_g, norm_b, tmean):
    M = x.shape[0]
    return pl.pallas_call(
        _make_enc_post_kernel(True),
        out_shape=jax.ShapeDtypeStruct((M, D_MODEL), F32),
        in_specs=[VMEM] * 10,
        out_specs=VMEM,
    )(x, attn, ma, lp['attn']['Wo'], lp['attn']['bo'], lp['W1'], lp['W2'],
      norm_g, norm_b, tmean)


def enc_post_mid(x, attn, lp, ma, next_wq, next_bq):
    M = x.shape[0]
    return pl.pallas_call(
        _make_enc_post_kernel(False),
        out_shape=(jax.ShapeDtypeStruct((M, D_MODEL), F32),
                   jax.ShapeDtypeStruct((M, D_MODEL), F32)),
        in_specs=[VMEM] * 9,
        out_specs=(VMEM, VMEM),
    )(x, attn, ma, lp['attn']['Wo'], lp['attn']['bo'], lp['W1'], lp['W2'],
      next_wq, next_bq)


def _dec_self_post_kernel(x_ref, a_ref, ma_ref, wo_ref, bo_ref,
                          wqc_ref, bqc_ref, cross_ref, wkc_ref, bkc_ref,
                          xs_ref, t1_ref, qc_ref, kc_ref):
    """Decoder self-attn out proj + residual + decomp1, plus cross-attn Q/K projs."""
    x = x_ref[...] + _dot(a_ref[...], wo_ref[...]) + bo_ref[...]
    t1 = _dot(ma_ref[...], x)
    xs = x - t1
    xs_ref[...] = xs
    t1_ref[...] = t1
    qc_ref[...] = _dot(xs, wqc_ref[...]) + bqc_ref[...]
    kc_ref[...] = _dot(cross_ref[...], wkc_ref[...]) + bkc_ref[...]


def dec_self_post(x, attn, lp, ma, cross):
    M = x.shape[0]
    Mc = cross.shape[0]
    sa, ca = lp['self_attn'], lp['cross_attn']
    return pl.pallas_call(
        _dec_self_post_kernel,
        out_shape=(jax.ShapeDtypeStruct((M, D_MODEL), F32),
                   jax.ShapeDtypeStruct((M, D_MODEL), F32),
                   jax.ShapeDtypeStruct((M, D_MODEL), F32),
                   jax.ShapeDtypeStruct((Mc, D_MODEL), F32)),
        in_specs=[VMEM] * 10,
        out_specs=(VMEM,) * 4,
    )(x, attn, ma, sa['Wo'], sa['bo'], ca['Wq'], ca['bq'], cross, ca['Wk'], ca['bk'])


def _make_dec_cross_post_kernel(is_last):
    if is_last:
        def kernel(xs_ref, a_ref, t1_ref, ma_ref, wo_ref, bo_ref, w1_ref, w2_ref,
                   pprev_ref, pnext_ref, twm1_ref, tw0_ref, twp1_ref,
                   trend0_ref, g_ref, b_ref, tmean_ref, projw_ref, projb_ref,
                   rvw_ref, rvb_ref, rmean_ref, rstd_ref, out_ref):
            x, t2, t3 = _dec_chain(xs_ref[...], a_ref[...], wo_ref[...], bo_ref[...],
                                   ma_ref[...], w1_ref[...], w2_ref[...])
            rt = t1_ref[...] + t2 + t3
            trend = trend0_ref[...] + _trend_proj(rt, pprev_ref[...], pnext_ref[...],
                                                  twm1_ref[...], tw0_ref[...],
                                                  twp1_ref[...])
            xn = _layernorm_time(x, g_ref[...], b_ref[...], tmean_ref[...])
            seasonal = _dot(xn, projw_ref[...]) + projb_ref[...]
            dec = trend + seasonal
            # RevIN denorm (affine)
            dec = (dec - rvb_ref[...]) / (rvw_ref[...] + EPS_REVIN * EPS_REVIN)
            out_ref[...] = dec * rstd_ref[...] + rmean_ref[...]
    else:
        def kernel(xs_ref, a_ref, t1_ref, ma_ref, wo_ref, bo_ref, w1_ref, w2_ref,
                   pprev_ref, pnext_ref, twm1_ref, tw0_ref, twp1_ref,
                   wqn_ref, bqn_ref, x_ref, rt_ref, qn_ref):
            x, t2, t3 = _dec_chain(xs_ref[...], a_ref[...], wo_ref[...], bo_ref[...],
                                   ma_ref[...], w1_ref[...], w2_ref[...])
            rt = t1_ref[...] + t2 + t3
            rt_ref[...] = _trend_proj(rt, pprev_ref[...], pnext_ref[...],
                                      twm1_ref[...], tw0_ref[...], twp1_ref[...])
            x_ref[...] = x
            qn_ref[...] = _dot(x, wqn_ref[...]) + bqn_ref[...]
    return kernel


def dec_cross_post_last(xs, attn, t1, lp, ma, pprev, pnext, trend0, dec_p,
                        rvw, rvb, rev_mean_flat, rev_std_flat, tmean):
    M = xs.shape[0]
    ca = lp['cross_attn']
    return pl.pallas_call(
        _make_dec_cross_post_kernel(True),
        out_shape=jax.ShapeDtypeStruct((M, C_OUT), F32),
        in_specs=[VMEM] * 23,
        out_specs=VMEM,
    )(xs, attn, t1, ma, ca['Wo'], ca['bo'], lp['W1'], lp['W2'],
      pprev, pnext, lp['trend_wm1'], lp['trend_w0'], lp['trend_wp1'],
      trend0, dec_p['norm_g'], dec_p['norm_b'], tmean,
      dec_p['proj_w'], dec_p['proj_b'],
      rvw, rvb, rev_mean_flat, rev_std_flat)


def dec_cross_post_mid(xs, attn, t1, lp, ma, pprev, pnext, next_wq, next_bq):
    M = xs.shape[0]
    ca = lp['cross_attn']
    return pl.pallas_call(
        _make_dec_cross_post_kernel(False),
        out_shape=(jax.ShapeDtypeStruct((M, D_MODEL), F32),
                   jax.ShapeDtypeStruct((M, C_OUT), F32),
                   jax.ShapeDtypeStruct((M, D_MODEL), F32)),
        in_specs=[VMEM] * 15,
        out_specs=(VMEM,) * 3,
    )(xs, attn, t1, ma, ca['Wo'], ca['bo'], lp['W1'], lp['W2'],
      pprev, pnext, lp['trend_wm1'], lp['trend_w0'], lp['trend_wp1'],
      next_wq, next_bq)


# ----------------------------- frequency-domain attention (plain JAX) -----------------------------
# TODO(synk): rfft/irfft + complex einsums have no Pallas TPU equivalent; kept in JAX.
def complex_tanh(z):
    """Numerically stable complex tanh: (sinh(2x) + i sin(2y)) / (cosh(2x) + cos(2y))."""
    x2 = jnp.clip(2.0 * jnp.real(z), -40.0, 40.0)
    y2 = 2.0 * jnp.imag(z)
    den = jnp.cosh(x2) + jnp.cos(y2)
    return jax.lax.complex(jnp.sinh(x2) / den, jnp.sin(y2) / den)


def fourier_block_flat(q_flat, weights, B, L):
    """FourierBlock (self attention). mode_select='low' -> contiguous modes, so the
    per-mode scatter loop is one einsum + one pad. Returns the flat view-quirk output."""
    H, E = N_HEADS, D_MODEL // N_HEADS
    q = q_flat.reshape(B, L, H, E)
    x = jnp.transpose(q, (0, 2, 3, 1))                    # [B, H, E, L]
    x_ft = jnp.fft.rfft(x, axis=-1)
    nbins = L // 2 + 1
    m = min(weights.shape[-1], nbins)
    out_m = jnp.einsum('bhim,hiom->bhom', x_ft[..., :m], weights[..., :m])
    out_ft = jnp.pad(out_m, ((0, 0), (0, 0), (0, 0), (0, nbins - m)))
    out = jnp.fft.irfft(out_ft, n=L, axis=-1)             # [B, H, E, L]
    # reference quirk: raw .view(B, L, -1) on the [B, H, E, L] tensor
    return out.reshape(B * L, H * E)


def fourier_cross_attention_flat(q_flat, k_flat, weights, B, Lq, Lkv):
    H, E = N_HEADS, D_MODEL // N_HEADS
    q = q_flat.reshape(B, Lq, H, E)
    k = k_flat.reshape(B, Lkv, H, E)
    xq = jnp.transpose(q, (0, 2, 3, 1))                   # [B, H, E, Lq]
    xk = jnp.transpose(k, (0, 2, 3, 1))
    mq = min(weights.shape[-1], Lq // 2 + 1)
    mkv = min(MODES, Lkv // 2)
    xq_ft = jnp.fft.rfft(xq, axis=-1)[..., :mq]
    xk_ft = jnp.fft.rfft(xk, axis=-1)[..., :mkv]
    xqk = jnp.einsum('bhex,bhey->bhxy', xq_ft, xk_ft)
    xqk = complex_tanh(xqk)                               # cross activation = 'tanh'
    xqkv = jnp.einsum('bhxy,bhey->bhex', xqk, xk_ft)
    xqkvw = jnp.einsum('bhex,heox->bhox', xqkv, weights[..., :mq])
    nbins = Lq // 2 + 1
    out_ft = jnp.pad(xqkvw, ((0, 0), (0, 0), (0, 0), (0, nbins - mq)))
    out = jnp.fft.irfft(out_ft / D_MODEL / D_MODEL, n=Lq, axis=-1)
    return out.reshape(B * Lq, H * E)                     # same view quirk


# ----------------------------- full forward -----------------------------
def fedformer_forward(params, x_enc, x_mark_enc, x_dec, x_mark_dec,
                      x_weather=None, y_weather=None):
    B, L_enc, C = x_enc.shape
    L_dec = x_dec.shape[1]                                # x_dec values themselves unused (matches reference)
    M_enc, M_dec = B * L_enc, B * L_dec

    x_enc = x_enc.astype(F32)

    # ---- RevIN 'norm' (affine, subtract_last=False); tiny reductions stay in JAX ----
    rev_mean = jnp.mean(x_enc, axis=1, keepdims=True)
    rev_std = jnp.sqrt(jnp.var(x_enc, axis=1, keepdims=True) + EPS_REVIN)
    x = (x_enc - rev_mean) / rev_std
    x = x * params['revin_w'] + params['revin_b']

    # ---- static block-diagonal operators (trace-time constants) ----
    ma_enc = jnp.asarray(_block_diag(_moving_avg_matrix(L_enc, MOVING_AVG), B))
    ma_dec = jnp.asarray(_block_diag(_moving_avg_matrix(L_dec, MOVING_AVG), B))
    tmean_enc = jnp.asarray(_block_diag(_time_mean_matrix(L_enc), B))
    tmean_dec = jnp.asarray(_block_diag(_time_mean_matrix(L_dec), B))
    pprev_enc = jnp.asarray(_block_diag(_circ_shift_matrix(L_enc, -1), B))
    pnext_enc = jnp.asarray(_block_diag(_circ_shift_matrix(L_enc, +1), B))
    pprev_dec = jnp.asarray(_block_diag(_circ_shift_matrix(L_dec, -1), B))
    pnext_dec = jnp.asarray(_block_diag(_circ_shift_matrix(L_dec, +1), B))

    # ---- decomposition init (tiny, plain JAX using the MA operator) ----
    x_flat = x.reshape(M_enc, C)
    trend = (ma_enc @ x_flat).reshape(B, L_enc, C)
    seasonal = x - trend
    mean_rep = jnp.repeat(jnp.mean(x, axis=1, keepdims=True), PRED_LEN, axis=1)
    trend_init = jnp.concatenate([trend[:, -LABEL_LEN:, :], mean_rep], axis=1)
    seasonal_init = jnp.pad(seasonal[:, -LABEL_LEN:, :],
                            ((0, 0), (0, PRED_LEN), (0, 0)))

    pe = params['pe']
    pe_enc = jnp.tile(pe[:L_enc], (B, 1))
    pe_dec = jnp.tile(pe[:L_dec], (B, 1))

    # ---- encoder ----
    enc_layers = params['encoder']['layers']
    emb_enc, q = embed_and_q(x_flat,
                             x_mark_enc.reshape(M_enc, MARK_DIM).astype(F32),
                             pe_enc, pprev_enc, pnext_enc, params['enc_emb'],
                             enc_layers[0]['attn']['Wq'], enc_layers[0]['attn']['bq'])
    x_e = emb_enc
    enc_out = None
    for li, lp in enumerate(enc_layers):
        attn = fourier_block_flat(q, lp['attn']['freq_w'], B, L_enc)
        if li == len(enc_layers) - 1:
            enc_out = enc_post_last(x_e, attn, lp, ma_enc,
                                    params['encoder']['norm_g'],
                                    params['encoder']['norm_b'], tmean_enc)
        else:
            nxt = enc_layers[li + 1]
            x_e, q = enc_post_mid(x_e, attn, lp, ma_enc,
                                  nxt['attn']['Wq'], nxt['attn']['bq'])

    # ---- decoder ----
    dec_layers = params['decoder']['layers']
    emb_dec, q_s = embed_and_q(seasonal_init.reshape(M_dec, C),
                               x_mark_dec.reshape(M_dec, MARK_DIM).astype(F32),
                               pe_dec, pprev_dec, pnext_dec, params['dec_emb'],
                               dec_layers[0]['self_attn']['Wq'],
                               dec_layers[0]['self_attn']['bq'])
    rev_mean_flat = jnp.broadcast_to(rev_mean, (B, L_dec, C)).reshape(M_dec, C)
    rev_std_flat = jnp.broadcast_to(rev_std, (B, L_dec, C)).reshape(M_dec, C)
    rvw = params['revin_w'].reshape(1, C)
    rvb = params['revin_b'].reshape(1, C)

    x_d = emb_dec
    trend_acc = trend_init.reshape(M_dec, C)
    dec_out_flat = None
    for li, lp in enumerate(dec_layers):
        a_self = fourier_block_flat(q_s, lp['self_attn']['freq_w'], B, L_dec)
        xs, t1, q_c, k_c = dec_self_post(x_d, a_self, lp, ma_dec, enc_out)
        a_cross = fourier_cross_attention_flat(q_c, k_c, lp['cross_attn']['freq_w'],
                                               B, L_dec, L_enc)
        if li == len(dec_layers) - 1:
            dec_out_flat = dec_cross_post_last(
                xs, a_cross, t1, lp, ma_dec, pprev_dec, pnext_dec,
                trend_acc, params['decoder'], rvw, rvb,
                rev_mean_flat, rev_std_flat, tmean_dec)
        else:
            nxt = dec_layers[li + 1]
            x_d, rt, q_s = dec_cross_post_mid(xs, a_cross, t1, lp, ma_dec,
                                              pprev_dec, pnext_dec,
                                              nxt['self_attn']['Wq'],
                                              nxt['self_attn']['bq'])
            trend_acc = trend_acc + rt

    dec_out = dec_out_flat.reshape(B, L_dec, C)
    return dec_out[:, -PRED_LEN:, :]


# ----------------------------- parameter init -----------------------------
def init_params(key):
    keys = iter(jax.random.split(key, 64))

    def nrm(shape, scale=0.05):
        return (scale * jax.random.normal(next(keys), shape)).astype(F32)

    def zeros(shape):
        return jnp.zeros(shape, F32)

    def cplx(shape, scale):
        re = jax.random.uniform(next(keys), shape)
        im = jax.random.uniform(next(keys), shape)
        return (scale * (re + 1j * im)).astype(jnp.complex64)

    E = D_MODEL // N_HEADS
    scale_f = 1.0 / (D_MODEL * D_MODEL)

    def self_attn_params(n_modes):
        # K/V projections omitted: FourierBlock ignores k and v (dead in reference).
        return dict(Wq=nrm((D_MODEL, D_MODEL)), bq=zeros((1, D_MODEL)),
                    Wo=nrm((D_MODEL, D_MODEL)), bo=zeros((1, D_MODEL)),
                    freq_w=cplx((N_HEADS, E, E, n_modes), scale_f))

    def cross_attn_params(n_modes):
        # V projection omitted: FourierCrossAttention ignores v (dead in reference).
        return dict(Wq=nrm((D_MODEL, D_MODEL)), bq=zeros((1, D_MODEL)),
                    Wk=nrm((D_MODEL, D_MODEL)), bk=zeros((1, D_MODEL)),
                    Wo=nrm((D_MODEL, D_MODEL)), bo=zeros((1, D_MODEL)),
                    freq_w=cplx((N_HEADS, E, E, n_modes), scale_f))

    def emb_params(c_in):
        return dict(token_wm1=nrm((c_in, D_MODEL)),
                    token_w0=nrm((c_in, D_MODEL)),
                    token_wp1=nrm((c_in, D_MODEL)),
                    temporal_w=nrm((MARK_DIM, D_MODEL)))

    n_enc = len(get_frequency_modes(SEQ_LEN, MODES))
    n_dec = len(get_frequency_modes(SEQ_LEN // 2 + PRED_LEN, MODES))
    n_q = len(get_frequency_modes(SEQ_LEN // 2 + PRED_LEN, MODES))

    return dict(
        revin_w=jnp.ones((ENC_IN,), F32),
        revin_b=jnp.zeros((ENC_IN,), F32),
        pe=positional_encoding(512, D_MODEL),
        enc_emb=emb_params(ENC_IN),
        dec_emb=emb_params(ENC_IN),
        encoder=dict(
            layers=[dict(attn=self_attn_params(n_enc),
                         W1=nrm((D_MODEL, D_FF)), W2=nrm((D_FF, D_MODEL)))
                    for _ in range(E_LAYERS)],
            norm_g=jnp.ones((1, D_MODEL), F32),
            norm_b=jnp.zeros((1, D_MODEL), F32)),
        decoder=dict(
            layers=[dict(self_attn=self_attn_params(n_dec),
                         cross_attn=cross_attn_params(n_q),
                         W1=nrm((D_MODEL, D_FF)), W2=nrm((D_FF, D_MODEL)),
                         trend_wm1=nrm((D_MODEL, C_OUT)),
                         trend_w0=nrm((D_MODEL, C_OUT)),
                         trend_wp1=nrm((D_MODEL, C_OUT)))
                    for _ in range(D_LAYERS)],
            norm_g=jnp.ones((1, D_MODEL), F32),
            norm_b=jnp.zeros((1, D_MODEL), F32),
            proj_w=nrm((D_MODEL, C_OUT)),
            proj_b=zeros((1, C_OUT))),
    )


# ----------------------------- main -----------------------------
if __name__ == "__main__":
    key = jax.random.PRNGKey(0)
    kp, k1, k2, k3, k4 = jax.random.split(key, 5)
    params = init_params(kp)

    B = 2
    x_enc = jax.random.normal(k1, (B, SEQ_LEN, ENC_IN), F32)
    x_mark_enc = jax.random.normal(k2, (B, SEQ_LEN, MARK_DIM), F32)
    x_dec = jax.random.normal(k3, (B, DEC_LEN, ENC_IN), F32)
    x_mark_dec = jax.random.normal(k4, (B, DEC_LEN, MARK_DIM), F32)
    x_weather = jnp.zeros((B, SEQ_LEN, 1), F32)    # unused by forward
    y_weather = jnp.zeros((B, PRED_LEN, 1), F32)   # unused by forward

    fwd = jax.jit(fedformer_forward)
    out = jax.block_until_ready(
        fwd(params, x_enc, x_mark_enc, x_dec, x_mark_dec, x_weather, y_weather))

    assert out.shape == (B, PRED_LEN, C_OUT), out.shape
    assert bool(jnp.all(jnp.isfinite(out)))
    print("KERNEL_OK")
</pallas_src>

<mosaic_0001>
module attributes {stable_mosaic.version = 11 : i64} {
  func.func @_embed_q_kernel(%arg0: memref<32x4xf32, #tpu.memory_space<vmem>>, %arg1: memref<32x4xf32, #tpu.memory_space<vmem>>, %arg2: memref<32x32xf32, #tpu.memory_space<vmem>>, %arg3: memref<32x32xf32, #tpu.memory_space<vmem>>, %arg4: memref<32x32xf32, #tpu.memory_space<vmem>>, %arg5: memref<4x32xf32, #tpu.memory_space<vmem>>, %arg6: memref<4x32xf32, #tpu.memory_space<vmem>>, %arg7: memref<4x32xf32, #tpu.memory_space<vmem>>, %arg8: memref<4x32xf32, #tpu.memory_space<vmem>>, %arg9: memref<32x32xf32, #tpu.memory_space<vmem>>, %arg10: memref<1x32xf32, #tpu.memory_space<vmem>>, %arg11: memref<32x32xf32, #tpu.memory_space<vmem>>, %arg12: memref<32x32xf32, #tpu.memory_space<vmem>>) attributes {dimension_semantics = [], scalar_prefetch = 0 : i64, scratch_operands = 0 : i64, tpu.core_type = #tpu.core_type<tc>} {
    %c0 = arith.constant 0 : index
    %c0_0 = arith.constant 0 : index
    %0 = vector.load %arg0[%c0, %c0_0] : memref<32x4xf32, #tpu.memory_space<vmem>>, vector<32x4xf32>
    %c0_1 = arith.constant 0 : index
    %c0_2 = arith.constant 0 : index
    %1 = vector.load %arg3[%c0_1, %c0_2] : memref<32x32xf32, #tpu.memory_space<vmem>>, vector<32x32xf32>
    %cst = arith.constant dense<0.000000e+00> : vector<32x4xf32>
    %2 = tpu.matmul %1, %0, %cst {dimension_numbers = #tpu.dot_dimension_numbers<[1], [0], [0], [1], [0, 0, 1, 1], [], []>} : vector<32x32xf32>, vector<32x4xf32>, vector<32x4xf32> -> vector<32x4xf32>
    %c0_3 = arith.constant 0 : index
    %c0_4 = arith.constant 0 : index
    %3 = vector.load %arg4[%c0_3, %c0_4] : memref<32x32xf32, #tpu.memory_space<vmem>>, vector<32x32xf32>
    %cst_5 = arith.constant dense<0.000000e+00> : vector<32x4xf32>
    %4 = tpu.matmul %3, %0, %cst_5 {dimension_numbers = #tpu.dot_dimension_numbers<[1], [0], [0], [1], [0, 0, 1, 1], [], []>} : vector<32x32xf32>, vector<32x4xf32>, vector<32x4xf32> -> vector<32x4xf32>
    %c0_6 = arith.constant 0 : index
    %c0_7 = arith.constant 0 : index
    %5 = vector.load %arg5[%c0_6, %c0_7] : memref<4x32xf32, #tpu.memory_space<vmem>>, vector<4x32xf32>
    %cst_8 = arith.constant dense<0.000000e+00> : vector<32x32xf32>
    %6 = tpu.matmul %2, %5, %cst_8 {dimension_numbers = #tpu.dot_dimension_numbers<[1], [0], [0], [1], [0, 0, 1, 1], [], []>} : vector<32x4xf32>, vector<4x32xf32>, vector<32x32xf32> -> vector<32x32xf32>
    %c0_9 = arith.constant 0 : index
    %c0_10 = arith.constant 0 : index
    %7 = vector.load %arg6[%c0_9, %c0_10] : memref<4x32xf32, #tpu.memory_space<vmem>>, vector<4x32xf32>
    %cst_11 = arith.constant dense<0.000000e+00> : vector<32x32xf32>
    %8 = tpu.matmul %0, %7, %cst_11 {dimension_numbers = #tpu.dot_dimension_numbers<[1], [0], [0], [1], [0, 0, 1, 1], [], []>} : vector<32x4xf32>, vector<4x32xf32>, vector<32x32xf32> -> vector<32x32xf32>
    %9 = arith.addf %6, %8 : vector<32x32xf32>
    %c0_12 = arith.constant 0 : index
    %c0_13 = arith.constant 0 : index
    %10 = vector.load %arg7[%c0_12, %c0_13] : memref<4x32xf32, #tpu.memory_space<vmem>>, vector<4x32xf32>
    %cst_14 = arith.constant dense<0.000000e+00> : vector<32x32xf32>
    %11 = tpu.matmul %4, %10, %cst_14 {dimension_numbers = #tpu.dot_dimension_numbers<[1], [0], [0], [1], [0, 0, 1, 1], [], []>} : vector<32x4xf32>, vector<4x32xf32>, vector<32x32xf32> -> vector<32x32xf32>
    %12 = arith.addf %9, %11 : vector<32x32xf32>
    %c0_15 = arith.constant 0 : index
    %c0_16 = arith.constant 0 : index
    %13 = vector.load %arg1[%c0_15, %c0_16] : memref<32x4xf32, #tpu.memory_space<vmem>>, vector<32x4xf32>
    %c0_17 = arith.constant 0 : index
    %c0_18 = arith.constant 0 : index
    %14 = vector.load %arg8[%c0_17, %c0_18] : memref<4x32xf32, #tpu.memory_space<vmem>>, vector<4x32xf32>
    %cst_19 = arith.constant dense<0.000000e+00> : vector<32x32xf32>
    %15 = tpu.matmul %13, %14, %cst_19 {dimension_numbers = #tpu.dot_dimension_numbers<[1], [0], [0], [1], [0, 0, 1, 1], [], []>} : vector<32x4xf32>, vector<4x32xf32>, vector<32x32xf32> -> vector<32x32xf32>
    %16 = arith.addf %12, %15 : vector<32x32xf32>
    %c0_20 = arith.constant 0 : index
    %c0_21 = arith.constant 0 : index
    %17 = vector.load %arg2[%c0_20, %c0_21] : memref<32x32xf32, #tpu.memory_space<vmem>>, vector<32x32xf32>
    %18 = arith.addf %16, %17 : vector<32x32xf32>
    %c0_22 = arith.constant 0 : index
    %c0_23 = arith.constant 0 : index
    %19 = vector.load %arg11[%c0_22, %c0_23] : memref<32x32xf32, #tpu.memory_space<vmem>>, vector<32x32xf32>
    tpu.vector_store %arg11[%c0_22, %c0_23], %18 {strides = array<i32>} : memref<32x32xf32, #tpu.memory_space<vmem>>, vector<32x32xf32>,
    %c0_24 = arith.constant 0 : index
    %c0_25 = arith.constant 0 : index
    %20 = vector.load %arg9[%c0_24, %c0_25] : memref<32x32xf32, #tpu.memory_space<vmem>>, vector<32x32xf32>
    %cst_26 = arith.constant dense<0.000000e+00> : vector<32x32xf32>
    %21 = tpu.matmul %18, %20, %cst_26 {dimension_numbers = #tpu.dot_dimension_numbers<[1], [0], [0], [1], [0, 0, 1, 1], [], []>} : vector<32x32xf32>, vector<32x32xf32>, vector<32x32xf32> -> vector<32x32xf32>
    %c0_27 = arith.constant 0 : index
    %c0_28 = arith.constant 0 : index
    %22 = vector.load %arg10[%c0_27, %c0_28] : memref<1x32xf32, #tpu.memory_space<vmem>>, vector<1x32xf32>
    %23 = vector.broadcast %22 : vector<1x32xf32> to vector<32x32xf32>
    %24 = arith.addf %21, %23 : vector<32x32xf32>
    %c0_29 = arith.constant 0 : index
    %c0_30 = arith.constant 0 : index
    %25 = vector.load %arg12[%c0_29, %c0_30] : memref<32x32xf32, #tpu.memory_space<vmem>>, vector<32x32xf32>
    tpu.vector_store %arg12[%c0_29, %c0_30], %24 {strides = array<i32>} : memref<32x32xf32, #tpu.memory_space<vmem>>, vector<32x32xf32>,
    return
  }
}

module attributes {stable_mosaic.version = 11 : i64} {
  func.func @kernel(%arg0: memref<32x32xf32, #tpu.memory_space<vmem>>, %arg1: memref<32x32xf32, #tpu.memory_space<vmem>>, %arg2: memref<32x32xf32, #tpu.memory_space<vmem>>, %arg3: memref<32x32xf32, #tpu.memory_space<vmem>>, %arg4: memref<1x32xf32, #tpu.memory_space<vmem>>, %arg5: memref<32x64xf32, #tpu.memory_space<vmem>>, %arg6: memref<64x32xf32, #tpu.memory_space<vmem>>, %arg7: memref<1x32xf32, #tpu.memory_space<vmem>>, %arg8: memref<1x32xf32, #tpu.memory_space<vmem>>, %arg9: memref<32x32xf32, #tpu.memory_space<vmem>>, %arg10: memref<32x32xf32, #tpu.memory_space<vmem>>) attributes {dimension_semantics = [], scalar_prefetch = 0 : i64, scratch_operands = 0 : i64, tpu.core_type = #tpu.core_type<tc>} {
    %c0 = arith.constant 0 : index
    %c0_0 = arith.constant 0 : index
    %0 = vector.load %arg0[%c0, %c0_0] : memref<32x32xf32, #tpu.memory_space<vmem>>, vector<32x32xf32>
    %c0_1 = arith.constant 0 : index
    %c0_2 = arith.constant 0 : index
    %1 = vector.load %arg1[%c0_1, %c0_2] : memref<32x32xf32, #tpu.memory_space<vmem>>, vector<32x32xf32>
    %c0_3 = arith.constant 0 : index
    %c0_4 = arith.constant 0 : index
    %2 = vector.load %arg3[%c0_3, %c0_4] : memref<32x32xf32, #tpu.memory_space<vmem>>, vector<32x32xf32>
    %c0_5 = arith.constant 0 : index
    %c0_6 = arith.constant 0 : index
    %3 = vector.load %arg4[%c0_5, %c0_6] : memref<1x32xf32, #tpu.memory_space<vmem>>, vector<1x32xf32>
    %c0_7 = arith.constant 0 : index
    %c0_8 = arith.constant 0 : index
    %4 = vector.load %arg2[%c0_7, %c0_8] : memref<32x32xf32, #tpu.memory_space<vmem>>, vector<32x32xf32>
    %c0_9 = arith.constant 0 : index
    %c0_10 = arith.constant 0 : index
    %5 = vector.load %arg5[%c0_9, %c0_10] : memref<32x64xf32, #tpu.memory_space<vmem>>, vector<32x64xf32>
    %c0_11 = arith.constant 0 : index
    %c0_12 = arith.constant 0 : index
    %6 = vector.load %arg6[%c0_11, %c0_12] : memref<64x32xf32, #tpu.memory_space<vmem>>, vector<64x32xf32>
    %cst = arith.constant dense<0.000000e+00> : vector<32x32xf32>
    %7 = tpu.matmul %1, %2, %cst {dimension_numbers = #tpu.dot_dimension_numbers<[1], [0], [0], [1], [0, 0, 1, 1], [], []>} : vector<32x32xf32>, vector<32x32xf32>, vector<32x32xf32> -> vector<32x32xf32>
    %8 = arith.addf %0, %7 : vector<32x32xf32>
    %9 = vector.broadcast %3 : vector<1x32xf32> to vector<32x32xf32>
    %10 = arith.addf %8, %9 : vector<32x32xf32>
    %cst_13 = arith.constant dense<0.000000e+00> : vector<32x32xf32>
    %11 = tpu.matmul %4, %10, %cst_13 {dimension_numbers = #tpu.dot_dimension_numbers<[1], [0], [0], [1], [0, 0, 1, 1], [], []>} : vector<32x32xf32>, vector<32x32xf32>, vector<32x32xf32> -> vector<32x32xf32>
    %12 = arith.subf %10, %11 : vector<32x32xf32>
    %cst_14 = arith.constant dense<0.000000e+00> : vector<32x64xf32>
    %13 = tpu.matmul %12, %5, %cst_14 {dimension_numbers = #tpu.dot_dimension_numbers<[1], [0], [0], [1], [0, 0, 1, 1], [], []>} : vector<32x32xf32>, vector<32x64xf32>, vector<32x64xf32> -> vector<32x64xf32>
    %cst_15 = arith.constant 0.000000e+00 : f32
    %14 = vector.broadcast %cst_15 : f32 to vector<32x64xf32>
    %15 = arith.maximumf %13, %14 : vector<32x64xf32>
    %cst_16 = arith.constant dense<0.000000e+00> : vector<32x32xf32>
    %16 = tpu.matmul %15, %6, %cst_16 {dimension_numbers = #tpu.dot_dimension_numbers<[1], [0], [0], [1], [0, 0, 1, 1], [], []>} : vector<32x64xf32>, vector<64x32xf32>, vector<32x32xf32> -> vector<32x32xf32>
    %17 = arith.addf %12, %16 : vector<32x32xf32>
    %cst_17 = arith.constant dense<0.000000e+00> : vector<32x32xf32>
    %18 = tpu.matmul %4, %17, %cst_17 {dimension_numbers = #tpu.dot_dimension_numbers<[1], [0], [0], [1], [0, 0, 1, 1], [], []>} : vector<32x32xf32>, vector<32x32xf32>, vector<32x32xf32> -> vector<32x32xf32>
    %19 = arith.subf %17, %18 : vector<32x32xf32>
    %c0_18 = arith.constant 0 : index
    %c0_19 = arith.constant 0 : index
    %20 = vector.load %arg7[%c0_18, %c0_19] : memref<1x32xf32, #tpu.memory_space<vmem>>, vector<1x32xf32>
    %c0_20 = arith.constant 0 : index
    %c0_21 = arith.constant 0 : index
    %21 = vector.load %arg8[%c0_20, %c0_21] : memref<1x32xf32, #tpu.memory_space<vmem>>, vector<1x32xf32>
    %c0_22 = arith.constant 0 : index
    %c0_23 = arith.constant 0 : index
    %22 = vector.load %arg9[%c0_22, %c0_23] : memref<32x32xf32, #tpu.memory_space<vmem>>, vector<32x32xf32>
    %cst_24 = arith.constant dense<0.000000e+00> : vector<32xf32>
    %23 = vector.multi_reduction <add>, %19, %cst_24 [1] : vector<32x32xf32> to vector<32xf32>
    %24 = vector.shape_cast %23 : vector<32xf32> to vector<32x1xf32>
    %cst_25 = arith.constant 3.200000e+01 : f32
    %25 = vector.broadcast %cst_25 : f32 to vector<32x1xf32>
    %26 = arith.divf %24, %25 : vector<32x1xf32>
    %27 = vector.broadcast %26 : vector<32x1xf32> to vector<32x32xf32>
    %28 = arith.subf %19, %27 : vector<32x32xf32>
    %29 = arith.mulf %28, %28 : vector<32x32xf32>
    %cst_26 = arith.constant dense<0.000000e+00> : vector<32xf32>
    %30 = vector.multi_reduction <add>, %29, %cst_26 [1] : vector<32x32xf32> to vector<32xf32>
    %31 = vector.shape_cast %30 : vector<32xf32> to vector<32x1xf32>
    %cst_27 = arith.constant 3.200000e+01 : f32
    %32 = vector.broadcast %cst_27 : f32 to vector<32x1xf32>
    %33 = arith.divf %31, %32 : vector<32x1xf32>
    %34 = vector.broadcast %26 : vector<32x1xf32> to vector<32x32xf32>
    %35 = arith.subf %19, %34 : vector<32x32xf32>
    %cst_28 = arith.constant 9.99999974E-6 : f32
    %36 = vector.broadcast %cst_28 : f32 to vector<32x1xf32>
    %37 = arith.addf %33, %36 : vector<32x1xf32>
    %38 = math.rsqrt %37 : vector<32x1xf32>
    %39 = vector.broadcast %38 : vector<32x1xf32> to vector<32x32xf32>
    %40 = arith.mulf %35, %39 : vector<32x32xf32>
    %41 = vector.broadcast %20 : vector<1x32xf32> to vector<32x32xf32>
    %42 = arith.mulf %40, %41 : vector<32x32xf32>
    %43 = vector.broadcast %21 : vector<1x32xf32> to vector<32x32xf32>
    %44 = arith.addf %42, %43 : vector<32x32xf32>
    %cst_29 = arith.constant dense<0.000000e+00> : vector<32x32xf32>
    %45 = tpu.matmul %22, %44, %cst_29 {dimension_numbers = #tpu.dot_dimension_numbers<[1], [0], [0], [1], [0, 0, 1, 1], [], []>} : vector<32x32xf32>, vector<32x32xf32>, vector<32x32xf32> -> vector<32x32xf32>
    %46 = arith.subf %44, %45 : vector<32x32xf32>
    %c0_30 = arith.constant 0 : index
    %c0_31 = arith.constant 0 : index
    %47 = vector.load %arg10[%c0_30, %c0_31] : memref<32x32xf32, #tpu.memory_space<vmem>>, vector<32x32xf32>
    tpu.vector_store %arg10[%c0_30, %c0_31], %46 {strides = array<i32>} : memref<32x32xf32, #tpu.memory_space<vmem>>, vector<32x32xf32>,
    return
  }
}

module attributes {stable_mosaic.version = 11 : i64} {
  func.func @_dec_self_post_kernel(%arg0: memref<32x32xf32, #tpu.memory_space<vmem>>, %arg1: memref<32x32xf32, #tpu.memory_space<vmem>>, %arg2: memref<32x32xf32, #tpu.memory_space<vmem>>, %arg3: memref<32x32xf32, #tpu.memory_space<vmem>>, %arg4: memref<1x32xf32, #tpu.memory_space<vmem>>, %arg5: memref<32x32xf32, #tpu.memory_space<vmem>>, %arg6: memref<1x32xf32, #tpu.memory_space<vmem>>, %arg7: memref<32x32xf32, #tpu.memory_space<vmem>>, %arg8: memref<32x32xf32, #tpu.memory_space<vmem>>, %arg9: memref<1x32xf32, #tpu.memory_space<vmem>>, %arg10: memref<32x32xf32, #tpu.memory_space<vmem>>, %arg11: memref<32x32xf32, #tpu.memory_space<vmem>>, %arg12: memref<32x32xf32, #tpu.memory_space<vmem>>, %arg13: memref<32x32xf32, #tpu.memory_space<vmem>>) attributes {dimension_semantics = [], scalar_prefetch = 0 : i64, scratch_operands = 0 : i64, tpu.core_type = #tpu.core_type<tc>} {
    %c0 = arith.constant 0 : index
    %c0_0 = arith.constant 0 : index
    %0 = vector.load %arg0[%c0, %c0_0] : memref<32x32xf32, #tpu.memory_space<vmem>>, vector<32x32xf32>
    %c0_1 = arith.constant 0 : index
    %c0_2 = arith.constant 0 : index
    %1 = vector.load %arg1[%c0_1, %c0_2] : memref<32x32xf32, #tpu.memory_space<vmem>>, vector<32x32xf32>
    %c0_3 = arith.constant 0 : index
    %c0_4 = arith.constant 0 : index
    %2 = vector.load %arg3[%c0_3, %c0_4] : memref<32x32xf32, #tpu.memory_space<vmem>>, vector<32x32xf32>
    %cst = arith.constant dense<0.000000e+00> : vector<32x32xf32>
    %3 = tpu.matmul %1, %2, %cst {dimension_numbers = #tpu.dot_dimension_numbers<[1], [0], [0], [1], [0, 0, 1, 1], [], []>} : vector<32x32xf32>, vector<32x32xf32>, vector<32x32xf32> -> vector<32x32xf32>
    %4 = arith.addf %0, %3 : vector<32x32xf32>
    %c0_5 = arith.constant 0 : index
    %c0_6 = arith.constant 0 : index
    %5 = vector.load %arg4[%c0_5, %c0_6] : memref<1x32xf32, #tpu.memory_space<vmem>>, vector<1x32xf32>
    %6 = vector.broadcast %5 : vector<1x32xf32> to vector<32x32xf32>
    %7 = arith.addf %4, %6 : vector<32x32xf32>
    %c0_7 = arith.constant 0 : index
    %c0_8 = arith.constant 0 : index
    %8 = vector.load %arg2[%c0_7, %c0_8] : memref<32x32xf32, #tpu.memory_space<vmem>>, vector<32x32xf32>
    %cst_9 = arith.constant dense<0.000000e+00> : vector<32x32xf32>
    %9 = tpu.matmul %8, %7, %cst_9 {dimension_numbers = #tpu.dot_dimension_numbers<[1], [0], [0], [1], [0, 0, 1, 1], [], []>} : vector<32x32xf32>, vector<32x32xf32>, vector<32x32xf32> -> vector<32x32xf32>
    %10 = arith.subf %7, %9 : vector<32x32xf32>
    %c0_10 = arith.constant 0 : index
    %c0_11 = arith.constant 0 : index
    %11 = vector.load %arg10[%c0_10, %c0_11] : memref<32x32xf32, #tpu.memory_space<vmem>>, vector<32x32xf32>
    tpu.vector_store %arg10[%c0_10, %c0_11], %10 {strides = array<i32>} : memref<32x32xf32, #tpu.memory_space<vmem>>, vector<32x32xf32>,
    %c0_12 = arith.constant 0 : index
    %c0_13 = arith.constant 0 : index
    %12 = vector.load %arg11[%c0_12, %c0_13] : memref<32x32xf32, #tpu.memory_space<vmem>>, vector<32x32xf32>
    tpu.vector_store %arg11[%c0_12, %c0_13], %9 {strides = array<i32>} : memref<32x32xf32, #tpu.memory_space<vmem>>, vector<32x32xf32>,
    %c0_14 = arith.constant 0 : index
    %c0_15 = arith.constant 0 : index
    %13 = vector.load %arg5[%c0_14, %c0_15] : memref<32x32xf32, #tpu.memory_space<vmem>>, vector<32x32xf32>
    %cst_16 = arith.constant dense<0.000000e+00> : vector<32x32xf32>
    %14 = tpu.matmul %10, %13, %cst_16 {dimension_numbers = #tpu.dot_dimension_numbers<[1], [0], [0], [1], [0, 0, 1, 1], [], []>} : vector<32x32xf32>, vector<32x32xf32>, vector<32x32xf32> -> vector<32x32xf32>
    %c0_17 = arith.constant 0 : index
    %c0_18 = arith.constant 0 : index
    %15 = vector.load %arg6[%c0_17, %c0_18] : memref<1x32xf32, #tpu.memory_space<vmem>>, vector<1x32xf32>
    %16 = vector.broadcast %15 : vector<1x32xf32> to vector<32x32xf32>
    %17 = arith.addf %14, %16 : vector<32x32xf32>
    %c0_19 = arith.constant 0 : index
    %c0_20 = arith.constant 0 : index
    %18 = vector.load %arg12[%c0_19, %c0_20] : memref<32x32xf32, #tpu.memory_space<vmem>>, vector<32x32xf32>
    tpu.vector_store %arg12[%c0_19, %c0_20], %17 {strides = array<i32>} : memref<32x32xf32, #tpu.memory_space<vmem>>, vector<32x32xf32>,
    %c0_21 = arith.constant 0 : index
    %c0_22 = arith.constant 0 : index
    %19 = vector.load %arg7[%c0_21, %c0_22] : memref<32x32xf32, #tpu.memory_space<vmem>>, vector<32x32xf32>
    %c0_23 = arith.constant 0 : index
    %c0_24 = arith.constant 0 : index
    %20 = vector.load %arg8[%c0_23, %c0_24] : memref<32x32xf32, #tpu.memory_space<vmem>>, vector<32x32xf32>
    %cst_25 = arith.constant dense<0.000000e+00> : vector<32x32xf32>
    %21 = tpu.matmul %19, %20, %cst_25 {dimension_numbers = #tpu.dot_dimension_numbers<[1], [0], [0], [1], [0, 0, 1, 1], [], []>} : vector<32x32xf32>, vector<32x32xf32>, vector<32x32xf32> -> vector<32x32xf32>
    %c0_26 = arith.constant 0 : index
    %c0_27 = arith.constant 0 : index
    %22 = vector.load %arg9[%c0_26, %c0_27] : memref<1x32xf32, #tpu.memory_space<vmem>>, vector<1x32xf32>
    %23 = vector.broadcast %22 : vector<1x32xf32> to vector<32x32xf32>
    %24 = arith.addf %21, %23 : vector<32x32xf32>
    %c0_28 = arith.constant 0 : index
    %c0_29 = arith.constant 0 : index
    %25 = vector.load %arg13[%c0_28, %c0_29] : memref<32x32xf32, #tpu.memory_space<vmem>>, vector<32x32xf32>
    tpu.vector_store %arg13[%c0_28, %c0_29], %24 {strides = array<i32>} : memref<32x32xf32, #tpu.memory_space<vmem>>, vector<32x32xf32>,
    return
  }
}

module attributes {stable_mosaic.version = 11 : i64} {
  func.func @kernel(%arg0: memref<32x32xf32, #tpu.memory_space<vmem>>, %arg1: memref<32x32xf32, #tpu.memory_space<vmem>>, %arg2: memref<32x32xf32, #tpu.memory_space<vmem>>, %arg3: memref<32x32xf32, #tpu.memory_space<vmem>>, %arg4: memref<32x32xf32, #tpu.memory_space<vmem>>, %arg5: memref<1x32xf32, #tpu.memory_space<vmem>>, %arg6: memref<32x64xf32, #tpu.memory_space<vmem>>, %arg7: memref<64x32xf32, #tpu.memory_space<vmem>>, %arg8: memref<32x32xf32, #tpu.memory_space<vmem>>, %arg9: memref<32x32xf32, #tpu.memory_space<vmem>>, %arg10: memref<32x4xf32, #tpu.memory_space<vmem>>, %arg11: memref<32x4xf32, #tpu.memory_space<vmem>>, %arg12: memref<32x4xf32, #tpu.memory_space<vmem>>, %arg13: memref<32x4xf32, #tpu.memory_space<vmem>>, %arg14: memref<1x32xf32, #tpu.memory_space<vmem>>, %arg15: memref<1x32xf32, #tpu.memory_space<vmem>>, %arg16: memref<32x32xf32, #tpu.memory_space<vmem>>, %arg17: memref<32x4xf32, #tpu.memory_space<vmem>>, %arg18: memref<1x4xf32, #tpu.memory_space<vmem>>, %arg19: memref<1x4xf32, #tpu.memory_space<vmem>>, %arg20: memref<1x4xf32, #tpu.memory_space<vmem>>, %arg21: memref<32x4xf32, #tpu.memory_space<vmem>>, %arg22: memref<32x4xf32, #tpu.memory_space<vmem>>, %arg23: memref<32x4xf32, #tpu.memory_space<vmem>>) attributes {dimension_semantics = [], scalar_prefetch = 0 : i64, scratch_operands = 0 : i64, tpu.core_type = #tpu.core_type<tc>} {
    %c0 = arith.constant 0 : index
    %c0_0 = arith.constant 0 : index
    %0 = vector.load %arg0[%c0, %c0_0] : memref<32x32xf32, #tpu.memory_space<vmem>>, vector<32x32xf32>
    %c0_1 = arith.constant 0 : index
    %c0_2 = arith.constant 0 : index
    %1 = vector.load %arg1[%c0_1, %c0_2] : memref<32x32xf32, #tpu.memory_space<vmem>>, vector<32x32xf32>
    %c0_3 = arith.constant 0 : index
    %c0_4 = arith.constant 0 : index
    %2 = vector.load %arg4[%c0_3, %c0_4] : memref<32x32xf32, #tpu.memory_space<vmem>>, vector<32x32xf32>
    %c0_5 = arith.constant 0 : index
    %c0_6 = arith.constant 0 : index
    %3 = vector.load %arg5[%c0_5, %c0_6] : memref<1x32xf32, #tpu.memory_space<vmem>>, vector<1x32xf32>
    %c0_7 = arith.constant 0 : index
    %c0_8 = arith.constant 0 : index
    %4 = vector.load %arg3[%c0_7, %c0_8] : memref<32x32xf32, #tpu.memory_space<vmem>>, vector<32x32xf32>
    %c0_9 = arith.constant 0 : index
    %c0_10 = arith.constant 0 : index
    %5 = vector.load %arg6[%c0_9, %c0_10] : memref<32x64xf32, #tpu.memory_space<vmem>>, vector<32x64xf32>
    %c0_11 = arith.constant 0 : index
    %c0_12 = arith.constant 0 : index
    %6 = vector.load %arg7[%c0_11, %c0_12] : memref<64x32xf32, #tpu.memory_space<vmem>>, vector<64x32xf32>
    %cst = arith.constant dense<0.000000e+00> : vector<32x32xf32>
    %7 = tpu.matmul %1, %2, %cst {dimension_numbers = #tpu.dot_dimension_numbers<[1], [0], [0], [1], [0, 0, 1, 1], [], []>} : vector<32x32xf32>, vector<32x32xf32>, vector<32x32xf32> -> vector<32x32xf32>
    %8 = arith.addf %0, %7 : vector<32x32xf32>
    %9 = vector.broadcast %3 : vector<1x32xf32> to vector<32x32xf32>
    %10 = arith.addf %8, %9 : vector<32x32xf32>
    %cst_13 = arith.constant dense<0.000000e+00> : vector<32x32xf32>
    %11 = tpu.matmul %4, %10, %cst_13 {dimension_numbers = #tpu.dot_dimension_numbers<[1], [0], [0], [1], [0, 0, 1, 1], [], []>} : vector<32x32xf32>, vector<32x32xf32>, vector<32x32xf32> -> vector<32x32xf32>
    %12 = arith.subf %10, %11 : vector<32x32xf32>
    %cst_14 = arith.constant dense<0.000000e+00> : vector<32x64xf32>
    %13 = tpu.matmul %12, %5, %cst_14 {dimension_numbers = #tpu.dot_dimension_numbers<[1], [0], [0], [1], [0, 0, 1, 1], [], []>} : vector<32x32xf32>, vector<32x64xf32>, vector<32x64xf32> -> vector<32x64xf32>
    %cst_15 = arith.constant 0.000000e+00 : f32
    %14 = vector.broadcast %cst_15 : f32 to vector<32x64xf32>
    %15 = arith.maximumf %13, %14 : vector<32x64xf32>
    %cst_16 = arith.constant dense<0.000000e+00> : vector<32x32xf32>
    %16 = tpu.matmul %15, %6, %cst_16 {dimension_numbers = #tpu.dot_dimension_numbers<[1], [0], [0], [1], [0, 0, 1, 1], [], []>} : vector<32x64xf32>, vector<64x32xf32>, vector<32x32xf32> -> vector<32x32xf32>
    %17 = arith.addf %12, %16 : vector<32x32xf32>
    %cst_17 = arith.constant dense<0.000000e+00> : vector<32x32xf32>
    %18 = tpu.matmul %4, %17, %cst_17 {dimension_numbers = #tpu.dot_dimension_numbers<[1], [0], [0], [1], [0, 0, 1, 1], [], []>} : vector<32x32xf32>, vector<32x32xf32>, vector<32x32xf32> -> vector<32x32xf32>
    %19 = arith.subf %17, %18 : vector<32x32xf32>
    %c0_18 = arith.constant 0 : index
    %c0_19 = arith.constant 0 : index
    %20 = vector.load %arg2[%c0_18, %c0_19] : memref<32x32xf32, #tpu.memory_space<vmem>>, vector<32x32xf32>
    %21 = arith.addf %20, %11 : vector<32x32xf32>
    %22 = arith.addf %21, %18 : vector<32x32xf32>
    %c0_20 = arith.constant 0 : index
    %c0_21 = arith.constant 0 : index
    %23 = vector.load %arg13[%c0_20, %c0_21] : memref<32x4xf32, #tpu.memory_space<vmem>>, vector<32x4xf32>
    %c0_22 = arith.constant 0 : index
    %c0_23 = arith.constant 0 : index
    %24 = vector.load %arg8[%c0_22, %c0_23] : memref<32x32xf32, #tpu.memory_space<vmem>>, vector<32x32xf32>
    %c0_24 = arith.constant 0 : index
    %c0_25 = arith.constant 0 : index
    %25 = vector.load %arg9[%c0_24, %c0_25] : memref<32x32xf32, #tpu.memory_space<vmem>>, vector<32x32xf32>
    %c0_26 = arith.constant 0 : index
    %c0_27 = arith.constant 0 : index
    %26 = vector.load %arg10[%c0_26, %c0_27] : memref<32x4xf32, #tpu.memory_space<vmem>>, vector<32x4xf32>
    %c0_28 = arith.constant 0 : index
    %c0_29 = arith.constant 0 : index
    %27 = vector.load %arg11[%c0_28, %c0_29] : memref<32x4xf32, #tpu.memory_space<vmem>>, vector<32x4xf32>
    %c0_30 = arith.constant 0 : index
    %c0_31 = arith.constant 0 : index
    %28 = vector.load %arg12[%c0_30, %c0_31] : memref<32x4xf32, #tpu.memory_space<vmem>>, vector<32x4xf32>
    %cst_32 = arith.constant dense<0.000000e+00> : vector<32x32xf32>
    %29 = tpu.matmul %24, %22, %cst_32 {dimension_numbers = #tpu.dot_dimension_numbers<[1], [0], [0], [1], [0, 0, 1, 1], [], []>} : vector<32x32xf32>, vector<32x32xf32>, vector<32x32xf32> -> vector<32x32xf32>
    %cst_33 = arith.constant dense<0.000000e+00> : vector<32x4xf32>
    %30 = tpu.matmul %29, %26, %cst_33 {dimension_numbers = #tpu.dot_dimension_numbers<[1], [0], [0], [1], [0, 0, 1, 1], [], []>} : vector<32x32xf32>, vector<32x4xf32>, vector<32x4xf32> -> vector<32x4xf32>
    %cst_34 = arith.constant dense<0.000000e+00> : vector<32x4xf32>
    %31 = tpu.matmul %22, %27, %cst_34 {dimension_numbers = #tpu.dot_dimension_numbers<[1], [0], [0], [1], [0, 0, 1, 1], [], []>} : vector<32x32xf32>, vector<32x4xf32>, vector<32x4xf32> -> vector<32x4xf32>
    %32 = arith.addf %30, %31 : vector<32x4xf32>
    %cst_35 = arith.constant dense<0.000000e+00> : vector<32x32xf32>
    %33 = tpu.matmul %25, %22, %cst_35 {dimension_numbers = #tpu.dot_dimension_numbers<[1], [0], [0], [1], [0, 0, 1, 1], [], []>} : vector<32x32xf32>, vector<32x32xf32>, vector<32x32xf32> -> vector<32x32xf32>
    %cst_36 = arith.constant dense<0.000000e+00> : vector<32x4xf32>
    %34 = tpu.matmul %33, %28, %cst_36 {dimension_numbers = #tpu.dot_dimension_numbers<[1], [0], [0], [1], [0, 0, 1, 1], [], []>} : vector<32x32xf32>, vector<32x4xf32>, vector<32x4xf32> -> vector<32x4xf32>
    %35 = arith.addf %32, %34 : vector<32x4xf32>
    %36 = arith.addf %23, %35 : vector<32x4xf32>
    %c0_37 = arith.constant 0 : index
    %c0_38 = arith.constant 0 : index
    %37 = vector.load %arg14[%c0_37, %c0_38] : memref<1x32xf32, #tpu.memory_space<vmem>>, vector<1x32xf32>
    %c0_39 = arith.constant 0 : index
    %c0_40 = arith.constant 0 : index
    %38 = vector.load %arg15[%c0_39, %c0_40] : memref<1x32xf32, #tpu.memory_space<vmem>>, vector<1x32xf32>
    %c0_41 = arith.constant 0 : index
    %c0_42 = arith.constant 0 : index
    %39 = vector.load %arg16[%c0_41, %c0_42] : memref<32x32xf32, #tpu.memory_space<vmem>>, vector<32x32xf32>
    %cst_43 = arith.constant dense<0.000000e+00> : vector<32xf32>
    %40 = vector.multi_reduction <add>, %19, %cst_43 [1] : vector<32x32xf32> to vector<32xf32>
    %41 = vector.shape_cast %40 : vector<32xf32> to vector<32x1xf32>
    %cst_44 = arith.constant 3.200000e+01 : f32
    %42 = vector.broadcast %cst_44 : f32 to vector<32x1xf32>
    %43 = arith.divf %41, %42 : vector<32x1xf32>
    %44 = vector.broadcast %43 : vector<32x1xf32> to vector<32x32xf32>
    %45 = arith.subf %19, %44 : vector<32x32xf32>
    %46 = arith.mulf %45, %45 : vector<32x32xf32>
    %cst_45 = arith.constant dense<0.000000e+00> : vector<32xf32>
    %47 = vector.multi_reduction <add>, %46, %cst_45 [1] : vector<32x32xf32> to vector<32xf32>
    %48 = vector.shape_cast %47 : vector<32xf32> to vector<32x1xf32>
    %cst_46 = arith.constant 3.200000e+01 : f32
    %49 = vector.broadcast %cst_46 : f32 to vector<32x1xf32>
    %50 = arith.divf %48, %49 : vector<32x1xf32>
    %51 = vector.broadcast %43 : vector<32x1xf32> to vector<32x32xf32>
    %52 = arith.subf %19, %51 : vector<32x32xf32>
    %cst_47 = arith.constant 9.99999974E-6 : f32
    %53 = vector.broadcast %cst_47 : f32 to vector<32x1xf32>
    %54 = arith.addf %50, %53 : vector<32x1xf32>
    %55 = math.rsqrt %54 : vector<32x1xf32>
    %56 = vector.broadcast %55 : vector<32x1xf32> to vector<32x32xf32>
    %57 = arith.mulf %52, %56 : vector<32x32xf32>
    %58 = vector.broadcast %37 : vector<1x32xf32> to vector<32x32xf32>
    %59 = arith.mulf %57, %58 : vector<32x32xf32>
    %60 = vector.broadcast %38 : vector<1x32xf32> to vector<32x32xf32>
    %61 = arith.addf %59, %60 : vector<32x32xf32>
    %cst_48 = arith.constant dense<0.000000e+00> : vector<32x32xf32>
    %62 = tpu.matmul %39, %61, %cst_48 {dimension_numbers = #tpu.dot_dimension_numbers<[1], [0], [0], [1], [0, 0, 1, 1], [], []>} : vector<32x32xf32>, vector<32x32xf32>, vector<32x32xf32> -> vector<32x32xf32>
    %63 = arith.subf %61, %62 : vector<32x32xf32>
    %c0_49 = arith.constant 0 : index
    %c0_50 = arith.constant 0 : index
    %64 = vector.load %arg17[%c0_49, %c0_50] : memref<32x4xf32, #tpu.memory_space<vmem>>, vector<32x4xf32>
    %cst_51 = arith.constant dense<0.000000e+00> : vector<32x4xf32>
    %65 = tpu.matmul %63, %64, %cst_51 {dimension_numbers = #tpu.dot_dimension_numbers<[1], [0], [0], [1], [0, 0, 1, 1], [], []>} : vector<32x32xf32>, vector<32x4xf32>, vector<32x4xf32> -> vector<32x4xf32>
    %c0_52 = arith.constant 0 : index
    %c0_53 = arith.constant 0 : index
    %66 = vector.load %arg18[%c0_52, %c0_53] : memref<1x4xf32, #tpu.memory_space<vmem>>, vector<1x4xf32>
    %67 = vector.broadcast %66 : vector<1x4xf32> to vector<32x4xf32>
    %68 = arith.addf %65, %67 : vector<32x4xf32>
    %69 = arith.addf %36, %68 : vector<32x4xf32>
    %c0_54 = arith.constant 0 : index
    %c0_55 = arith.constant 0 : index
    %70 = vector.load %arg20[%c0_54, %c0_55] : memref<1x4xf32, #tpu.memory_space<vmem>>, vector<1x4xf32>
    %71 = vector.broadcast %70 : vector<1x4xf32> to vector<32x4xf32>
    %72 = arith.subf %69, %71 : vector<32x4xf32>
    %c0_56 = arith.constant 0 : index
    %c0_57 = arith.constant 0 : index
    %73 = vector.load %arg19[%c0_56, %c0_57] : memref<1x4xf32, #tpu.memory_space<vmem>>, vector<1x4xf32>
    %cst_58 = arith.constant 1.000000e-10 : f32
    %74 = vector.broadcast %cst_58 : f32 to vector<1x4xf32>
    %75 = arith.addf %73, %74 : vector<1x4xf32>
    %76 = vector.broadcast %75 : vector<1x4xf32> to vector<32x4xf32>
    %77 = arith.divf %72, %76 : vector<32x4xf32>
    %c0_59 = arith.constant 0 : index
    %c0_60 = arith.constant 0 : index
    %78 = vector.load %arg22[%c0_59, %c0_60] : memref<32x4xf32, #tpu.memory_space<vmem>>, vector<32x4xf32>
    %79 = arith.mulf %77, %78 : vector<32x4xf32>
    %c0_61 = arith.constant 0 : index
    %c0_62 = arith.constant 0 : index
    %80 = vector.load %arg21[%c0_61, %c0_62] : memref<32x4xf32, #tpu.memory_space<vmem>>, vector<32x4xf32>
    %81 = arith.addf %79, %80 : vector<32x4xf32>
    %c0_63 = arith.constant 0 : index
    %c0_64 = arith.constant 0 : index
    %82 = vector.load %arg23[%c0_63, %c0_64] : memref<32x4xf32, #tpu.memory_space<vmem>>, vector<32x4xf32>
    tpu.vector_store %arg23[%c0_63, %c0_64], %81 {strides = array<i32>} : memref<32x4xf32, #tpu.memory_space<vmem>>, vector<32x4xf32>,
    return
  }
}

</mosaic_0001>

<bundles_post_ra>
// kernel: custom-call
= control target key start
LH: loop header
LB: loop body
LE: loop exit
PB: predicated region body
PF: predicated region fallthrough
CT: control target
= control target key end

     0   :  { %2 = vsyncpa [#allocation0], 0  ;;  %s61_s0 = inlined_call_operand.hbm [shape: c64[8,4,4,8], index: 0, kind: input, shape index: {}]   ;;  %s62_s1 = inlined_call_operand.vmem [shape: f32[8,4,4,8], index: 1, kind: output, shape index: {}]  }
   0x1   :  { %s3_s8 = sshll.u32 %s62_s1, 4  ;;  %s9_s11 = scalar_lea.hbm %s61_s0, 2048  ;;  %s4_s8 = int_to_ptr.vmem [resolvable:$true] %s3_s8 }
   0x2   :  { %p10_p0 = scmp.ne.s32.totalorder %s61_s0, %s9_s11  ;;  %s11_s16 = scalar_lea.hbm %s61_s0, 4096 }
   0x3   :  { %p12_p1 = scmp.lt.u32.totalorder %s11_s16, %s9_s11  ;;  %p13_p2 = scmp.lt.u32.totalorder %s9_s11, %s61_s0 }
   0x5   :  { %p14_p3 = por %p13_p2, %p12_p1 }
   0x7   :  { %p15_p4 = pnand %p14_p3, %p10_p0 }
   0x9   :  { %18 = shalt.err (!%p15_p4)  }
   0xa   :  { %s19_s1 = scalar_lea.vmem %s4_s8, 2048  ;;  %p24_p6 = scmp.lt.s32.totalorder %s4_s8, %s4_s8 }
   0xb   :  { %p20_p5 = scmp.ne.s32.totalorder %s4_s8, %s19_s1  ;;  %p25_p7 = scmp.lt.s32.totalorder %s19_s1, %s19_s1 }
   0xd   :  { %p26_p8 = por %p25_p7, %p24_p6 }
   0xf   :  { %p27_p9 = pnand %p26_p8, %p20_p5 }
  0x11   :  { %30 = shalt.err (!%p27_p9)  }
  0x12   :  { %6 = dma.hbm_to_vmem [thread:$0]  %s61_s0, 2048, %s4_s8, [#allocation0] }
  0x13   :  { %31 = dma.done.wait [#allocation0], 2048  }
  0x14   :  { %32 = vsyncadd [#allocation0], 4294965248 }
  0x15   :  { %8 = vsyncpa [#allocation0], 1 }

// kernel: custom-call.1
= control target key start
LH: loop header
LB: loop body
LE: loop exit
PB: predicated region body
PF: predicated region fallthrough
CT: control target
= control target key end

     0   :  { %s59_s0 = inlined_call_operand.hbm [shape: c64[8,4,4,8], index: 0, kind: input, shape index: {}]   ;;  %s60_s1 = inlined_call_operand.vmem [shape: f32[8,4,4,8], index: 1, kind: output, shape index: {}]  }
   0x1   :  { %s2_s8 = scalar_lea.hbm %s59_s0, 2048 }
   0x2   :  { %3 = vsyncpa [#allocation0], 0  ;;  %s4_s11 = sshll.u32 %s60_s1, 4  ;;  %s34_s14 = scalar_lea.hbm %s59_s0, 4096  ;;  %s5_s11 = int_to_ptr.vmem [resolvable:$true] %s4_s11 }
   0x3   :  { %p11_p0 = scmp.ne.s32.totalorder %s2_s8, %s34_s14  ;;  %p13_p1 = scmp.lt.u32.totalorder %s2_s8, %s59_s0 }
   0x4   :  { %p14_p2 = scmp.lt.u32.totalorder %s34_s14, %s34_s14  ;;  %p16_p4 = scmp.lt.u32.totalorder %s34_s14, %s2_s8 }
   0x6   :  { %p15_p3 = por %p14_p2, %p13_p1 }
   0x8   :  { %p17_p5 = por %p16_p4, %p15_p3 }
   0xa   :  { %p18_p6 = pnand %p17_p5, %p11_p0 }
   0xc   :  { %21 = shalt.err (!%p18_p6)  }
   0xd   :  { %s22_s17 = scalar_lea.vmem %s5_s11, 2048  ;;  %p27_p8 = scmp.lt.s32.totalorder %s5_s11, %s5_s11 }
   0xe   :  { %p23_p7 = scmp.ne.s32.totalorder %s5_s11, %s22_s17  ;;  %p28_p9 = scmp.lt.s32.totalorder %s22_s17, %s22_s17 }
  0x10   :  { %p29_p10 = por %p28_p9, %p27_p8 }
  0x12   :  { %p30_p11 = pnand %p29_p10, %p23_p7 }
  0x14   :  { %33 = shalt.err (!%p30_p11)  }
  0x15   :  { %7 = dma.hbm_to_vmem [thread:$0]  %s2_s8, 2048, %s5_s11, [#allocation0] }
  0x16   :  { %35 = dma.done.wait [#allocation0], 2048  }
  0x17   :  { %36 = vsyncadd [#allocation0], 4294965248 }
  0x18   :  { %9 = vsyncpa [#allocation0], 1 }

// kernel: fedformer_forward.5
= control target key start
LH: loop header
LB: loop body
LE: loop exit
PB: predicated region body
PF: predicated region fallthrough
CT: control target
= control target key end

     0   :  { %vm48_vm0 = vcmask 261120   ;;  %vm249_vm1 = vcmask 31744   ;;  %vm262_vm2 = vcmask 1043456   ;;  %s1204_s0 = inlined_call_operand.vmem [shape: f32[32,4], index: 0, kind: input, shape index: {}]   ;;  %s1205_s3 = inlined_call_operand.vmem [shape: f32[32,32], index: 3, kind: input, shape index: {}]   ;;  %s1206_s6 = inlined_call_operand.vmem [shape: f32[4,32], index: 6, kind: input, shape index: {}]   ;;  %s1207_s5 = inlined_call_operand.vmem [shape: f32[4,32], index: 5, kind: input, shape index: {}]   ;;  %s1208_s4 = inlined_call_operand.vmem [shape: f32[32,32], index: 4, kind: input, shape index: {}]   ;;  %s1209_s7 = inlined_call_operand.vmem [shape: f32[4,32], index: 7, kind: input, shape index: {}]   ;;  %s1210_s9 = inlined_call_operand.vmem [shape: f32[32,32], index: 9, kind: input, shape index: {}]   ;;  %s1211_s8 = inlined_call_operand.vmem [shape: f32[4,32], index: 8, kind: input, shape index: {}]   ;;  %s1212_s1 = inlined_call_operand.vmem [shape: f32[32,4], index: 1, kind: input, shape index: {}]   ;;  %s1213_s2 = inlined_call_operand.vmem [shape: f32[32,32], index: 2, kind: input, shape index: {}]   ;;  %s1214_s11 = inlined_call_operand.vmem [shape: f32[32,32], index: 11, kind: output, shape index: {0}]   ;;  %s1215_s10 = inlined_call_operand.vmem [shape: f32[1,32], index: 10, kind: input, shape index: {}]   ;;  %s1216_s12 = inlined_call_operand.vmem [shape: f32[32,32], index: 12, kind: output, shape index: {1}]  }
   0x1   :  { %v40_v0 = vld [vmem:[%s1204_s0] sm:$0xff]  ;;  %v41_v1 = vld [vmem:[%s1204_s0 + $0x8] sm:$0xff]  ;;  %v42_v2 = vld [vmem:[%s1204_s0 + $0x10] sm:$0xff] }
   0x2   :  { %v948_v3 = vpack.c.bf16 %v41_v1, %v40_v0  ;;  %v43_v4 = vld [vmem:[%s1204_s0 + $0x18] sm:$0xff]  ;;  %v44_v5 = vld [vmem:[%s1205_s3] sm:$0xff]  ;;  %904 = vmatprep.mubr.msk.f32.mxu0 %vm249_vm1, %v40_v0  ;;  %v45_v9 = vld [vmem:[%s1205_s3 + $0x8] sm:$0xff] }
   0x3   :  { %v952_v6 = vpack.c.bf16 %v43_v4, %v42_v2  ;;  %882 = vmatprep.mubr.msk.f32.mxu1 %vm48_vm0, %v44_v5  ;;  %v248_v7 = vld [vmem:[%s1206_s6] sm:$0xf]  ;;  %v46_v10 = vld [vmem:[%s1205_s3 + $0x10] sm:$0xff]  ;;  %v47_v11 = vld [vmem:[%s1205_s3 + $0x18] sm:$0xff] }
   0x4   :  { %949 = vmatprep.subr.bf16.mxu1 %v948_v3  ;;  %v247_v8 = vld [vmem:[%s1207_s5] sm:$0xf]  ;;  %902 = vmatprep.subr.msk.mxu0 %vm262_vm2, %v248_v7  ;;  %v147_v13 = vld [vmem:[%s1208_s4 + $0x8] sm:$0xff]  ;;  %v148_v14 = vld [vmem:[%s1208_s4 + $0x10] sm:$0xff] }
   0x5   :  { %951 = vmatpush3.bf16.msra.mxu1 %v948_v3  ;;  %903 = vmatpush3.msk.msra.mxu0 %vm262_vm2, %v248_v7  ;;  %v146_v12 = vld [vmem:[%s1208_s4] sm:$0xff]  ;;  %v149_v15 = vld [vmem:[%s1208_s4 + $0x18] sm:$0xff]  ;;  %v678_v18 = vld [vmem:[%s1210_s9 + $0x8] sm:$0xff] }
   0x6   :  { %953 = vmatprep.subr.bf16.mxu1 %v952_v6  ;;  %905 = vmatmul.mubr.msk.f32.vlgmr.msra.gmra.mrb[0].mxu0 %vm249_vm1, %v41_v1  ;;  %v451_v16 = vld [vmem:[%s1209_s7] sm:$0xf]  ;;  %v557_v30 = vld [vmem:[%s1212_s1 + $0x8] sm:$0xff]  ;;  %v558_v31 = vld [vmem:[%s1212_s1 + $0x10] sm:$0xff] }
   0x7   :  { %910 = vmatprep.subr.msk.mxu0 %vm262_vm2, %v247_v8  ;;  %907 = vmatprep.mubr.msk.f32.mxu0 %vm249_vm1, %v42_v2  ;;  %v677_v17 = vld [vmem:[%s1210_s9] sm:$0xff]  ;;  %v559_v32 = vld [vmem:[%s1212_s1 + $0x18] sm:$0xff]  ;;  %v679_v33 = vld [vmem:[%s1210_s9 + $0x10] sm:$0xff] }
   0x8   :  { %911 = vmatpush3.msk.msra.mxu0 %vm262_vm2, %v247_v8  ;;  %v964_v19 = vpack.c.bf16 %v678_v18, %v677_v17  ;;  %v560_v22 = vld [vmem:[%s1211_s8] sm:$0xf]  ;;  %v680_v34 = vld [vmem:[%s1210_s9 + $0x18] sm:$0xff]  ;;  %v666_v36 = vld [vmem:[%s1213_s2 + $0x8] sm:$0xff] }
   0x9   :  { %955 = vmatpush3.bf16.msra.mxu1 %v952_v6  ;;  %918 = vmatprep.subr.msk.mxu0 %vm262_vm2, %v451_v16  ;;  %v556_v29 = vld [vmem:[%s1212_s1] sm:$0xff]  ;;  %v968_v35 = vpack.c.bf16 %v680_v34, %v679_v33  ;;  %v668_v42 = vld [vmem:[%s1213_s2 + $0x18] sm:$0xff]  ;;  %v667_v43 = vld [vmem:[%s1213_s2 + $0x10] sm:$0xff] }
   0xa   :  { %957 = vmatprep.subr.bf16.mxu1 %v948_v3  ;;  %908 = vmatmul.mubr.msk.f32.gmra.mrb[2].mxu0 %vm249_vm1, %v43_v4  ;;  %v665_v37 = vld [vmem:[%s1213_s2] sm:$0xff] }
   0xb   :  { %v825_v48 = vld [vmem:[%s1215_s10] ss:$0 sm:$0xff] }
   0xc   :  { %883 = vmatmul.mubr.msk.f32.vlgmr.msra.gmra.mrb[0].mxu1 %vm48_vm0, %v45_v9 }
   0xd   :  { %959 = vmatpush3.bf16.msra.mxu1 %v948_v3  ;;  %885 = vmatprep.mubr.msk.f32.mxu1 %vm48_vm0, %v46_v10 }
   0xe   :  { %961 = vmatprep.subr.bf16.mxu1 %v952_v6 }
  0x10   :  { %886 = vmatmul.mubr.msk.f32.gmra.mrb[2].mxu1 %vm48_vm0, %v47_v11 }
  0x11   :  { %963 = vmatpush3.bf16.msra.mxu1 %v952_v6  ;;  %896 = vmatprep.mubr.msk.f32.mxu1 %vm48_vm0, %v146_v12 }
  0x12   :  { %965 = vmatprep.subr.bf16.mxu1 %v964_v19 }
  0x14   :  { %897 = vmatmul.mubr.msk.f32.vlgmr.msra.gmra.mrb[4].mxu1 %vm48_vm0, %v147_v13 }
  0x15   :  { %899 = vmatprep.mubr.msk.f32.mxu1 %vm48_vm0, %v148_v14  ;;  %967 = vmatpush3.bf16.msra.mxu1 %v964_v19 }
  0x16   :  { %969 = vmatprep.subr.bf16.mxu1 %v968_v35 }
  0x18   :  { %900 = vmatmul.mubr.msk.f32.gmra.mrb[6].mxu1 %vm48_vm0, %v149_v15 }
  0x19   :  { %971 = vmatpush3.bf16.msra.mxu1 %v968_v35 }
  0xdf   :  { %v884_v20 = vpop.f32.mrb[0].mxu1 }
  0xe0   :  { %v127_v21 = vpop.f32.mrb[1].mxu1 }
  0xe1   :  { %912 = vmatprep.mubr.msk.f32.mxu0 %vm249_vm1, %v127_v21 }
  0xe2   :  { %913 = vmatmul.mubr.msk.f32.vlgmr.msra.gmra.mrb[0].mxu0 %vm249_vm1, %v884_v20 }
  0xe3   :  { %v887_v23 = vpop.f32.mrb[2].mxu1  ;;  %919 = vmatpush3.msk.msra.mxu0 %vm262_vm2, %v451_v16 }
  0xe4   :  { %v137_v24 = vpop.f32.mrb[3].mxu1  ;;  %926 = vmatprep.subr.msk.mxu0 %vm262_vm2, %v560_v22 }
  0xe5   :  { %915 = vmatprep.mubr.msk.f32.mxu0 %vm249_vm1, %v137_v24 }
  0xe6   :  { %916 = vmatmul.mubr.msk.f32.gmra.mrb[2].mxu0 %vm249_vm1, %v887_v23 }
  0xe7   :  { %v898_v25 = vpop.f32.mrb[4].mxu1 }
  0xe8   :  { %v228_v26 = vpop.f32.mrb[5].mxu1 }
  0xe9   :  { %920 = vmatprep.mubr.msk.f32.mxu0 %vm249_vm1, %v228_v26 }
  0xea   :  { %921 = vmatmul.mubr.msk.f32.vlgmr.msra.gmra.mrb[0].mxu0 %vm249_vm1, %v898_v25 }
  0xeb   :  { %v901_v27 = vpop.f32.mrb[6].mxu1  ;;  %927 = vmatpush3.msk.msra.mxu0 %vm262_vm2, %v560_v22 }
  0xec   :  { %v238_v28 = vpop.f32.mrb[7].mxu1 }
  0xed   :  { %923 = vmatprep.mubr.msk.f32.mxu0 %vm249_vm1, %v238_v28 }
  0xee   :  { %924 = vmatmul.mubr.msk.f32.gmra.mrb[2].mxu0 %vm249_vm1, %v901_v27 }
  0xef   :  { %928 = vmatprep.mubr.msk.f32.mxu0 %vm249_vm1, %v556_v29 }
  0xf2   :  { %929 = vmatmul.mubr.msk.f32.vlgmr.msra.gmra.mrb[0].mxu0 %vm249_vm1, %v557_v30 }
  0xf3   :  { %931 = vmatprep.mubr.msk.f32.mxu0 %vm249_vm1, %v558_v31 }
  0xf6   :  { %932 = vmatmul.mubr.msk.f32.gmra.mrb[2].mxu0 %vm249_vm1, %v559_v32 }
 0x1c5   :  { %v930_v38 = vpop.f32.mrb[0].mxu0 }
 0x1c6   :  { %v670_v39 = vadd.f32 %v930_v38, %v666_v36  ;;  %v642_v40 = vpop.f32.mrb[1].mxu0 }
 0x1c7   :  { %v669_v41 = vadd.f32 %v665_v37, %v642_v40 }
 0x1c8   :  { %674 = vst.msk [vmem:[%s1214_s11 + $0x8] sm:$0xff] %vm48_vm0, %v670_v39 }
 0x1c9   :  { %673 = vst.msk [vmem:[%s1214_s11] sm:$0xff] %vm48_vm0, %v669_v41  ;;  %v933_v44 = vpop.f32.mrb[2].mxu0  ;;  %942 = vmatprep.mubr.msk.f32.mxu1 %vm48_vm0, %v669_v41 }
 0x1ca   :  { %v672_v45 = vadd.f32 %v933_v44, %v668_v42  ;;  %v652_v46 = vpop.f32.mrb[3].mxu0  ;;  %943 = vmatmul.mubr.msk.f32.vlgmr.msra.gmra.mrb[8].mxu1 %vm48_vm0, %v670_v39 }
 0x1cb   :  { %v671_v47 = vadd.f32 %v667_v43, %v652_v46 }
 0x1cc   :  { %676 = vst.msk [vmem:[%s1214_s11 + $0x18] sm:$0xff] %vm48_vm0, %v672_v45 }
 0x1cd   :  { %675 = vst.msk [vmem:[%s1214_s11 + $0x10] sm:$0xff] %vm48_vm0, %v671_v47  ;;  %945 = vmatprep.mubr.msk.f32.mxu1 %vm48_vm0, %v671_v47 }
 0x1ce   :  { %946 = vmatmul.mubr.msk.f32.gmra.mrb[10].mxu1 %vm48_vm0, %v672_v45 }
 0x29d   :  { %v944_v49 = vpop.f32.mrb[8].mxu1 }
 0x29e   :  { %v772_v50 = vadd.f32 %v944_v49, %v825_v48  ;;  %v766_v51 = vpop.f32.mrb[9].mxu1 }
 0x29f   :  { %v767_v52 = vadd.f32 %v825_v48, %v766_v51 }
 0x2a0   :  { %786 = vst.msk [vmem:[%s1216_s12 + $0x8] sm:$0xff] %vm48_vm0, %v772_v50 }
 0x2a1   :  { %785 = vst.msk [vmem:[%s1216_s12] sm:$0xff] %vm48_vm0, %v767_v52  ;;  %v947_v53 = vpop.f32.mrb[10].mxu1 }
 0x2a2   :  { %v782_v54 = vadd.f32 %v947_v53, %v825_v48  ;;  %v776_v55 = vpop.f32.mrb[11].mxu1 }
 0x2a3   :  { %v777_v56 = vadd.f32 %v825_v48, %v776_v55 }
 0x2a4   :  { %788 = vst.msk [vmem:[%s1216_s12 + $0x18] sm:$0xff] %vm48_vm0, %v782_v54 }
 0x2a5   :  { %787 = vst.msk [vmem:[%s1216_s12 + $0x10] sm:$0xff] %vm48_vm0, %v777_v56 }

// kernel: reverse.6
= control target key start
LH: loop header
LB: loop body
LE: loop exit
PB: predicated region body
PF: predicated region fallthrough
CT: control target
= control target key end

     0   :  { %s176_s0 = inlined_call_operand.vmem [shape: f32[2,8,4,7], index: 0, kind: input, shape index: {}]   ;;  %s177_s1 = inlined_call_operand.vmem [shape: f32[2,8,4,7], index: 1, kind: output, shape index: {}]  }
   0x1   :  { %v56_v0 = vld [vmem:[%s176_s0 + $0x18] sm:$0xf]  ;;  %v57_v1 = vld [vmem:[%s176_s0 + $0x34] sm:$0xf]  ;;  %v61_v3 = vld [vmem:[%s176_s0 + $0x30] sm:$0xf] }
   0x2   :  { %v59_v2 = vld [vmem:[%s176_s0 + $0x14] sm:$0xf]  ;;  %4 = vst [vmem:[%s177_s1] sm:$0xf] %v56_v0  ;;  %58 = vst [vmem:[%s177_s1 + $0x1c] sm:$0xf] %v57_v1 }
   0x3   :  { %60 = vst [vmem:[%s177_s1 + $0x4] sm:$0xf] %v59_v2  ;;  %v63_v4 = vld [vmem:[%s176_s0 + $0x10] sm:$0xf]  ;;  %v65_v5 = vld [vmem:[%s176_s0 + $0x2c] sm:$0xf] }
   0x4   :  { %62 = vst [vmem:[%s177_s1 + $0x20] sm:$0xf] %v61_v3  ;;  %64 = vst [vmem:[%s177_s1 + $0x8] sm:$0xf] %v63_v4  ;;  %v67_v6 = vld [vmem:[%s176_s0 + $0xc] sm:$0xf] }
   0x5   :  { %66 = vst [vmem:[%s177_s1 + $0x24] sm:$0xf] %v65_v5  ;;  %v69_v7 = vld [vmem:[%s176_s0 + $0x28] sm:$0xf]  ;;  %68 = vst [vmem:[%s177_s1 + $0xc] sm:$0xf] %v67_v6 }
   0x6   :  { %v71_v8 = vld [vmem:[%s176_s0 + $0x8] sm:$0xf]  ;;  %70 = vst [vmem:[%s177_s1 + $0x28] sm:$0xf] %v69_v7  ;;  %v73_v9 = vld [vmem:[%s176_s0 + $0x24] sm:$0xf] }
   0x7   :  { %72 = vst [vmem:[%s177_s1 + $0x10] sm:$0xf] %v71_v8  ;;  %v75_v10 = vld [vmem:[%s176_s0 + $0x4] sm:$0xf]  ;;  %v77_v11 = vld [vmem:[%s176_s0 + $0x20] sm:$0xf] }
   0x8   :  { %74 = vst [vmem:[%s177_s1 + $0x2c] sm:$0xf] %v73_v9  ;;  %76 = vst [vmem:[%s177_s1 + $0x14] sm:$0xf] %v75_v10  ;;  %v49_v12 = vld [vmem:[%s176_s0] sm:$0xf] }
   0x9   :  { %78 = vst [vmem:[%s177_s1 + $0x30] sm:$0xf] %v77_v11  ;;  %v80_v13 = vld [vmem:[%s176_s0 + $0x1c] sm:$0xf]  ;;  %79 = vst [vmem:[%s177_s1 + $0x18] sm:$0xf] %v49_v12 }
   0xa   :  { %81 = vst [vmem:[%s177_s1 + $0x34] sm:$0xf] %v80_v13 }

// kernel: fedformer_forward.7
= control target key start
LH: loop header
LB: loop body
LE: loop exit
PB: predicated region body
PF: predicated region fallthrough
CT: control target
= control target key end

     0   :  { %vm64_vm0 = vcmask 261120   ;;  %vm378_vm1 = vcmask 523264   ;;  %s1216_s3 = inlined_call_operand.vmem [shape: f32[32,32], index: 3, kind: input, shape index: {}]   ;;  %s1217_s1 = inlined_call_operand.vmem [shape: f32[32,32], index: 1, kind: input, shape index: {}]   ;;  %s1218_s2 = inlined_call_operand.vmem [shape: f32[32,32], index: 2, kind: input, shape index: {}]   ;;  %s1219_s5 = inlined_call_operand.vmem [shape: f32[32,64], index: 5, kind: input, shape index: {}]   ;;  %s1220_s0 = inlined_call_operand.vmem [shape: f32[32,32], index: 0, kind: input, shape index: {}]   ;;  %s1221_s4 = inlined_call_operand.vmem [shape: f32[1,32], index: 4, kind: input, shape index: {}]   ;;  %s1222_s6 = inlined_call_operand.vmem [shape: f32[64,32], index: 6, kind: input, shape index: {}]   ;;  %s1223_s9 = inlined_call_operand.vmem [shape: f32[32,32], index: 9, kind: input, shape index: {}]   ;;  %s1224_s7 = inlined_call_operand.vmem [shape: f32[1,32], index: 7, kind: input, shape index: {}]   ;;  %s1225_s8 = inlined_call_operand.vmem [shape: f32[1,32], index: 8, kind: input, shape index: {}]   ;;  %s1226_s10 = inlined_call_operand.vmem [shape: f32[32,32], index: 10, kind: output, shape index: {}]  }
   0x1   :  { %v43_v0 = vld [vmem:[%s1216_s3] sm:$0xff]  ;;  %v44_v1 = vld [vmem:[%s1216_s3 + $0x8] sm:$0xff]  ;;  %v45_v2 = vld [vmem:[%s1216_s3 + $0x10] sm:$0xff] }
   0x2   :  { %v928_v3 = vpack.c.bf16 %v44_v1, %v43_v0  ;;  %v46_v4 = vld [vmem:[%s1216_s3 + $0x18] sm:$0xff]  ;;  %v39_v5 = vld [vmem:[%s1217_s1] sm:$0xff]  ;;  %v40_v7 = vld [vmem:[%s1217_s1 + $0x8] sm:$0xff] }
   0x3   :  { %v932_v6 = vpack.c.bf16 %v46_v4, %v45_v2  ;;  %844 = vmatprep.mubr.msk.f32.mxu0 %vm64_vm0, %v39_v5  ;;  %v41_v8 = vld [vmem:[%s1217_s1 + $0x10] sm:$0xff]  ;;  %v42_v9 = vld [vmem:[%s1217_s1 + $0x18] sm:$0xff]  ;;  %v1082_v10 = vld [vmem:[%s1218_s2] sm:$0xff] }
   0x4   :  { %929 = vmatprep.subr.bf16.mxu0 %v928_v3  ;;  %858 = vmatprep.mubr.msk.f32.mxu1 %vm64_vm0, %v1082_v10  ;;  %v52_v11 = vld [vmem:[%s1219_s5] sm:$0xff]  ;;  %v53_v12 = vld [vmem:[%s1219_s5 + $0x8] sm:$0xff]  ;;  %v38_v21 = vld [vmem:[%s1220_s0 + $0x18] sm:$0xff] }
   0x5   :  { %931 = vmatpush3.bf16.msra.mxu0 %v928_v3  ;;  %v944_v13 = vpack.c.bf16 %v53_v12, %v52_v11  ;;  %v36_v14 = vld [vmem:[%s1220_s0 + $0x8] sm:$0xff]  ;;  %v35_v15 = vld [vmem:[%s1220_s0] sm:$0xff]  ;;  %v37_v23 = vld [vmem:[%s1220_s0 + $0x10] sm:$0xff] }
   0x6   :  { %933 = vmatprep.subr.bf16.mxu0 %v932_v6  ;;  %v761_v16 = vld [vmem:[%s1221_s4] ss:$0 sm:$0xff]  ;;  %v1110_v33 = vld [vmem:[%s1218_s2 + $0x8] sm:$0xff]  ;;  %v1115_v34 = vld [vmem:[%s1218_s2 + $0x10] sm:$0xff] }
   0x7   :  { %v1124_v35 = vld [vmem:[%s1218_s2 + $0x18] sm:$0xff]  ;;  %v54_v36 = vld [vmem:[%s1219_s5 + $0x10] sm:$0xff]  ;;  %v56_v39 = vld [vmem:[%s1222_s6] sm:$0xff] }
   0x8   :  { %v55_v37 = vld [vmem:[%s1219_s5 + $0x18] sm:$0xff]  ;;  %v57_v40 = vld [vmem:[%s1222_s6 + $0x8] sm:$0xff]  ;;  %v58_v41 = vld [vmem:[%s1222_s6 + $0x10] sm:$0xff] }
   0x9   :  { %935 = vmatpush3.bf16.msra.mxu0 %v932_v6  ;;  %v948_v38 = vpack.c.bf16 %v55_v37, %v54_v36  ;;  %v952_v42 = vpack.c.bf16 %v57_v40, %v56_v39  ;;  %v59_v43 = vld [vmem:[%s1222_s6 + $0x18] sm:$0xff]  ;;  %v60_v45 = vld [vmem:[%s1222_s6 + $0x20] sm:$0xff]  ;;  %v61_v46 = vld [vmem:[%s1222_s6 + $0x28] sm:$0xff] }
   0xa   :  { %945 = vmatprep.subr.bf16.mxu0 %v944_v13  ;;  %v956_v44 = vpack.c.bf16 %v59_v43, %v58_v41  ;;  %v960_v47 = vpack.c.bf16 %v61_v46, %v60_v45  ;;  %v62_v56 = vld [vmem:[%s1222_s6 + $0x30] sm:$0xff]  ;;  %v63_v57 = vld [vmem:[%s1222_s6 + $0x38] sm:$0xff]  ;;  %v571_v45 = vld [vmem:[%s1223_s9] sm:$0xff] }
   0xb   :  { %v964_v58 = vpack.c.bf16 %v63_v57, %v62_v56  ;;  %v573_v46 = vld [vmem:[%s1223_s9 + $0x10] sm:$0xff] }
   0xc   :  { %845 = vmatmul.mubr.msk.f32.vlgmr.msra.gmra.mrb[0].mxu0 %vm64_vm0, %v40_v7 }
   0xd   :  { %847 = vmatprep.mubr.msk.f32.mxu0 %vm64_vm0, %v41_v8  ;;  %947 = vmatpush3.bf16.msra.mxu0 %v944_v13 }
   0xe   :  { %949 = vmatprep.subr.bf16.mxu0 %v948_v38 }
  0x10   :  { %848 = vmatmul.mubr.msk.f32.gmra.mrb[2].mxu0 %vm64_vm0, %v42_v9 }
  0x11   :  { %951 = vmatpush3.bf16.msra.mxu0 %v948_v38 }
  0xdf   :  { %v846_v17 = vpop.f32.mrb[0].mxu0 }
  0xe0   :  { %v163_v18 = vadd.f32 %v846_v17, %v36_v14  ;;  %v143_v19 = vpop.f32.mrb[1].mxu0 }
  0xe1   :  { %v162_v20 = vadd.f32 %v143_v19, %v35_v15 }
  0xe2   :  { %v173_v22 = vadd.f32 %v761_v16, %v163_v18 }
  0xe3   :  { %v172_v24 = vadd.f32 %v761_v16, %v162_v20  ;;  %v849_v25 = vpop.f32.mrb[2].mxu0 }
  0xe4   :  { %v165_v26 = vadd.f32 %v849_v25, %v38_v21  ;;  %v153_v27 = vpop.f32.mrb[3].mxu0 }
  0xe5   :  { %v164_v28 = vadd.f32 %v153_v27, %v37_v23  ;;  %v936_v29 = vpack.c.bf16 %v173_v22, %v172_v24 }
  0xe6   :  { %v175_v30 = vadd.f32 %v761_v16, %v165_v26 }
  0xe7   :  { %v174_v31 = vadd.f32 %v761_v16, %v164_v28  ;;  %937 = vmatprep.subr.bf16.mxu1 %v936_v29 }
  0xe8   :  { %939 = vmatpush3.bf16.msra.mxu1 %v936_v29 }
  0xe9   :  { %v940_v32 = vpack.c.bf16 %v175_v30, %v174_v31 }
  0xeb   :  { %941 = vmatprep.subr.bf16.mxu1 %v940_v32 }
  0xec   :  { %943 = vmatpush3.bf16.msra.mxu1 %v940_v32 }
  0xed   :  { %953 = vmatprep.subr.bf16.mxu1 %v952_v42 }
  0xef   :  { %859 = vmatmul.mubr.msk.f32.vlgmr.msra.gmra.mrb[0].mxu1 %vm64_vm0, %v1110_v33 }
  0xf0   :  { %861 = vmatprep.mubr.msk.f32.mxu1 %vm64_vm0, %v1115_v34  ;;  %955 = vmatpush3.bf16.msra.mxu1 %v952_v42 }
  0xf1   :  { %957 = vmatprep.subr.bf16.mxu1 %v956_v44 }
  0xf3   :  { %862 = vmatmul.mubr.msk.f32.gmra.mrb[2].mxu1 %vm64_vm0, %v1124_v35 }
  0xf4   :  { %959 = vmatpush3.bf16.msra.mxu1 %v956_v44 }
  0xf5   :  { %961 = vmatprep.subr.bf16.mxu1 %v960_v47 }
  0xf8   :  { %963 = vmatpush3.bf16.msra.mxu1 %v960_v47 }
  0xf9   :  { %965 = vmatprep.subr.bf16.mxu1 %v964_v58 }
  0xfc   :  { %967 = vmatpush3.bf16.msra.mxu1 %v964_v58 }
 0x1c2   :  { %v860_v48 = vpop.f32.mrb[0].mxu1 }
 0x1c3   :  { %v254_v49 = vpop.f32.mrb[1].mxu1  ;;  %v274_v51 = vsub.f32 %v173_v22, %v860_v48 }
 0x1c4   :  { %v273_v50 = vsub.f32 %v172_v24, %v254_v49 }
 0x1c6   :  { %v863_v52 = vpop.f32.mrb[2].mxu1  ;;  %872 = vmatprep.mubr.msk.f32.mxu0 %vm64_vm0, %v273_v50 }
 0x1c7   :  { %v264_v53 = vpop.f32.mrb[3].mxu1  ;;  %873 = vmatmul.mubr.msk.f32.vlgmr.msra.gmra.mrb[4].mxu0 %vm64_vm0, %v274_v51  ;;  %v276_v55 = vsub.f32 %v175_v30, %v863_v52 }
 0x1c8   :  { %v275_v54 = vsub.f32 %v174_v31, %v264_v53 }
 0x1ca   :  { %875 = vmatprep.mubr.msk.f32.mxu0 %vm64_vm0, %v275_v54 }
 0x1cb   :  { %876 = vmatmul.mubr.msk.f32.gmra.mrb[6].mxu0 %vm64_vm0, %v276_v55 }
 0x1cc   :  { %908 = vmatprep.mubr.msk.f32.mxu0 %vm64_vm0, %v1082_v10 }
 0x29a   :  { %v874_v59 = vpop.f32.mrb[4].mxu0 }
 0x29b   :  { %v355_v60 = vpop.f32.mrb[5].mxu0  ;;  %v375_v62 = vmax.f32 %v874_v59, 0.0 }
 0x29c   :  { %v374_v61 = vmax.f32 %v355_v60, 0.0 }
 0x29e   :  { %v877_v63 = vpop.f32.mrb[6].mxu0  ;;  %894 = vmatprep.mubr.msk.f32.mxu1 %vm378_vm1, %v374_v61  ;;  %v778_v61 = vld [vmem:[%s1224_s7] ss:$0 sm:$0xff] }
 0x29f   :  { %v365_v0 = vpop.f32.mrb[7].mxu0  ;;  %895 = vmatmul.mubr.msk.f32.vlgmr.msra.gmra.mrb[4].mxu1 %vm378_vm1, %v375_v62  ;;  %v377_v2 = vmax.f32 %v877_v63, 0.0 }
 0x2a0   :  { %v376_v1 = vmax.f32 %v365_v0, 0.0 }
 0x2a2   :  { %897 = vmatprep.mubr.msk.f32.mxu1 %vm378_vm1, %v376_v1 }
 0x2a3   :  { %898 = vmatmul.mubr.msk.f32.gmra.mrb[6].mxu1 %vm378_vm1, %v377_v2 }
 0x2a4   :  { %925 = vmatprep.mubr.msk.f32.mxu1 %vm64_vm0, %v573_v46 }
 0x372   :  { %v896_v3 = vpop.f32.mrb[4].mxu1 }
 0x373   :  { %v477_v4 = vadd.f32 %v896_v3, %v274_v51  ;;  %v457_v5 = vpop.f32.mrb[5].mxu1  ;;  %v779_v3 = vld [vmem:[%s1225_s8] ss:$0 sm:$0xff] }
 0x374   :  { %v476_v6 = vadd.f32 %v457_v5, %v273_v50 }
 0x376   :  { %v968_v7 = vpack.c.bf16 %v477_v4, %v476_v6  ;;  %v899_v8 = vpop.f32.mrb[6].mxu1 }
 0x377   :  { %v479_v9 = vadd.f32 %v899_v8, %v276_v55  ;;  %v467_v10 = vpop.f32.mrb[7].mxu1 }
 0x378   :  { %v478_v11 = vadd.f32 %v467_v10, %v275_v54  ;;  %969 = vmatprep.subr.bf16.mxu0 %v968_v7 }
 0x379   :  { %971 = vmatpush3.bf16.msra.mxu0 %v968_v7 }
 0x37a   :  { %v972_v12 = vpack.c.bf16 %v479_v9, %v478_v11 }
 0x37c   :  { %973 = vmatprep.subr.bf16.mxu0 %v972_v12 }
 0x37d   :  { %975 = vmatpush3.bf16.msra.mxu0 %v972_v12 }
 0x380   :  { %909 = vmatmul.mubr.msk.f32.vlgmr.msra.gmra.mrb[8].mxu0 %vm64_vm0, %v1110_v33 }
 0x381   :  { %911 = vmatprep.mubr.msk.f32.mxu0 %vm64_vm0, %v1115_v34 }
 0x384   :  { %912 = vmatmul.mubr.msk.f32.gmra.mrb[10].mxu0 %vm64_vm0, %v1124_v35 }
 0x385   :  { %922 = vmatprep.mubr.msk.f32.mxu0 %vm64_vm0, %v571_v45 }
 0x453   :  { %v910_v13 = vpop.f32.mrb[8].mxu0 }
 0x454   :  { %v546_v14 = vpop.f32.mrb[9].mxu0  ;;  %v566_v16 = vsub.f32 %v477_v4, %v910_v13 }
 0x455   :  { %v565_v15 = vsub.f32 %v476_v6, %v546_v14 }
 0x456   :  { %v578_v22 = vsel %vm64_vm0, %v566_v16, 0.0 }
 0x457   :  { %v913_v17 = vpop.f32.mrb[10].mxu0  ;;  %v575_v18 = vsel %vm64_vm0, %v565_v15, 0.0 }
 0x458   :  { %576 = vadd.xlane.f32.xlu0 %v575_v18  ;;  %v556_v19 = vpop.f32.mrb[11].mxu0  ;;  %v568_v21 = vsub.f32 %v479_v9, %v913_v17 }
 0x459   :  { %v567_v20 = vsub.f32 %v478_v11, %v556_v19 }
 0x45a   :  { %v584_v24 = vsel %vm64_vm0, %v568_v21, 0.0 }
 0x45b   :  { %v581_v23 = vsel %vm64_vm0, %v567_v20, 0.0 }
 0x45c   :  { %579 = vadd.xlane.f32.xlu0 %v578_v22  ;;  %582 = vadd.xlane.f32.xlu1 %v581_v23 }
 0x460   :  { %585 = vadd.xlane.f32.xlu1 %v584_v24 }
 0x4e5   :  { %v577_v25 = vpop.xlane.xlu0 %576 }
 0x4e6   :  { %v588_v26 = vmul.f32 0.03125, %v577_v25 }
 0x4e8   :  { %v592_v27 = vsub.f32 %v565_v15, %v588_v26  ;;  %v572_v15 = vld [vmem:[%s1223_s9 + $0x8] sm:$0xff] }
 0x4e9   :  { %v580_v28 = vpop.xlane.xlu0 %579  ;;  %v583_v29 = vpop.xlane.xlu1 %582 }
 0x4ea   :  { %v589_v30 = vmul.f32 0.03125, %v580_v28  ;;  %v590_v31 = vmul.f32 0.03125, %v583_v29  ;;  %v596_v32 = vmul.f32 %v592_v27, %v592_v27 }
 0x4ec   :  { %v593_v33 = vsub.f32 %v566_v16, %v589_v30  ;;  %v594_v34 = vsub.f32 %v567_v20, %v590_v31  ;;  %v600_v35 = vsel %vm64_vm0, %v596_v32, 0.0  ;;  %v574_v16 = vld [vmem:[%s1223_s9 + $0x18] sm:$0xff] }
 0x4ed   :  { %601 = vadd.xlane.f32.xlu0 %v600_v35  ;;  %v586_v36 = vpop.xlane.xlu1 %585 }
 0x4ee   :  { %v591_v37 = vmul.f32 0.03125, %v586_v36  ;;  %v597_v38 = vmul.f32 %v593_v33, %v593_v33  ;;  %v598_v39 = vmul.f32 %v594_v34, %v594_v34 }
 0x4f0   :  { %v595_v40 = vsub.f32 %v568_v21, %v591_v37  ;;  %v603_v41 = vsel %vm64_vm0, %v597_v38, 0.0  ;;  %v606_v42 = vsel %vm64_vm0, %v598_v39, 0.0 }
 0x4f1   :  { %604 = vadd.xlane.f32.xlu1 %v603_v41  ;;  %607 = vadd.xlane.f32.xlu0 %v606_v42 }
 0x4f2   :  { %v599_v43 = vmul.f32 %v595_v40, %v595_v40 }
 0x4f4   :  { %v609_v44 = vsel %vm64_vm0, %v599_v43, 0.0 }
 0x4f5   :  { %610 = vadd.xlane.f32.xlu1 %v609_v44 }
 0x57a   :  { %v602_v47 = vpop.xlane.xlu0 %601 }
 0x57b   :  { %v612_v48 = vmul.f32 0.03125, %v602_v47 }
 0x57d   :  { %v616_v49 = vadd.f32 1e-05, %v612_v48 }
 0x57e   :  { %v608_v50 = vpop.xlane.xlu0 %607  ;;  %v605_v51 = vpop.xlane.xlu1 %604 }
 0x57f   :  { %988 = vrsqrt.f32 %v616_v49  ;;  %v614_v52 = vmul.f32 0.03125, %v608_v50  ;;  %v613_v53 = vmul.f32 0.03125, %v605_v51 }
 0x581   :  { %v618_v54 = vadd.f32 1e-05, %v614_v52  ;;  %v617_v55 = vadd.f32 1e-05, %v613_v53 }
 0x582   :  { %v611_v56 = vpop.xlane.xlu1 %610 }
 0x583   :  { %990 = vrsqrt.f32 %v618_v54  ;;  %v615_v57 = vmul.f32 0.03125, %v611_v56 }
 0x584   :  { %992 = vrsqrt.f32 %v617_v55 }
 0x585   :  { %v619_v58 = vadd.f32 1e-05, %v615_v57 }
 0x587   :  { %994 = vrsqrt.f32 %v619_v58 }
 0x589   :  { %v989_v59 = vpop.eup %988 }
 0x58a   :  { %v624_v60 = vmul.f32 %v989_v59, %v592_v27 }
 0x58c   :  { %v634_v2 = vmul.f32 %v778_v61, %v624_v60 }
 0x58d   :  { %v991_v62 = vpop.eup %990 }
 0x58e   :  { %v993_v63 = vpop.eup %992  ;;  %v626_v0 = vmul.f32 %v991_v62, %v594_v34  ;;  %v644_v8 = vadd.f32 %v779_v3, %v634_v2 }
 0x58f   :  { %v625_v1 = vmul.f32 %v993_v63, %v593_v33 }
 0x590   :  { %v636_v7 = vmul.f32 %v778_v61, %v626_v0 }
 0x591   :  { %v995_v4 = vpop.eup %994  ;;  %v635_v5 = vmul.f32 %v778_v61, %v625_v1 }
 0x592   :  { %v627_v6 = vmul.f32 %v995_v4, %v595_v40  ;;  %v646_v12 = vadd.f32 %v779_v3, %v636_v7 }
 0x593   :  { %v645_v9 = vadd.f32 %v779_v3, %v635_v5 }
 0x594   :  { %v637_v10 = vmul.f32 %v778_v61, %v627_v6 }
 0x595   :  { %v976_v11 = vpack.c.bf16 %v645_v9, %v644_v8 }
 0x596   :  { %v647_v13 = vadd.f32 %v779_v3, %v637_v10 }
 0x597   :  { %977 = vmatprep.subr.bf16.mxu0 %v976_v11  ;;  %984 = vmatprep.subr.bf16.mxu1 %v976_v11 }
 0x598   :  { %979 = vmatpush3.bf16.msra.mxu0 %v976_v11  ;;  %986 = vmatpush3.bf16.msra.mxu1 %v976_v11  ;;  %v980_v14 = vpack.c.bf16 %v647_v13, %v646_v12 }
 0x59a   :  { %981 = vmatprep.subr.bf16.mxu0 %v980_v14  ;;  %985 = vmatprep.subr.bf16.mxu1 %v980_v14 }
 0x59c   :  { %983 = vmatpush3.bf16.msra.mxu0 %v980_v14  ;;  %987 = vmatpush3.bf16.msra.mxu1 %v980_v14 }
 0x59f   :  { %923 = vmatmul.mubr.msk.f32.vlgmr.msra.gmra.mrb[12].mxu0 %vm64_vm0, %v572_v15  ;;  %926 = vmatmul.mubr.msk.f32.vlgmr.msra.gmra.mrb[8].mxu1 %vm64_vm0, %v574_v16 }
 0x672   :  { %v924_v17 = vpop.f32.mrb[12].mxu0  ;;  %v927_v18 = vpop.f32.mrb[8].mxu1 }
 0x673   :  { %v746_v19 = vsub.f32 %v645_v9, %v924_v17  ;;  %v748_v20 = vsub.f32 %v647_v13, %v927_v18  ;;  %v726_v21 = vpop.f32.mrb[13].mxu0  ;;  %v736_v22 = vpop.f32.mrb[9].mxu1 }
 0x674   :  { %v745_v23 = vsub.f32 %v644_v8, %v726_v21  ;;  %v747_v24 = vsub.f32 %v646_v12, %v736_v22 }
 0x675   :  { %750 = vst.msk [vmem:[%s1226_s10 + $0x8] sm:$0xff] %vm64_vm0, %v746_v19  ;;  %752 = vst.msk [vmem:[%s1226_s10 + $0x18] sm:$0xff] %vm64_vm0, %v748_v20 }
 0x676   :  { %749 = vst.msk [vmem:[%s1226_s10] sm:$0xff] %vm64_vm0, %v745_v23  ;;  %751 = vst.msk [vmem:[%s1226_s10 + $0x10] sm:$0xff] %vm64_vm0, %v747_v24 }

// kernel: fedformer_forward.8
= control target key start
LH: loop header
LB: loop body
LE: loop exit
PB: predicated region body
PF: predicated region fallthrough
CT: control target
= control target key end

     0   :  { %vm51_vm0 = vcmask 261120   ;;  %s903_s3 = inlined_call_operand.vmem [shape: f32[32,32], index: 3, kind: input, shape index: {}]   ;;  %s904_s1 = inlined_call_operand.vmem [shape: f32[32,32], index: 1, kind: input, shape index: {}]   ;;  %s905_s2 = inlined_call_operand.vmem [shape: f32[32,32], index: 2, kind: input, shape index: {}]   ;;  %s906_s5 = inlined_call_operand.vmem [shape: f32[32,32], index: 5, kind: input, shape index: {}]   ;;  %s907_s0 = inlined_call_operand.vmem [shape: f32[32,32], index: 0, kind: input, shape index: {}]   ;;  %s908_s4 = inlined_call_operand.vmem [shape: f32[1,32], index: 4, kind: input, shape index: {}]   ;;  %s909_s8 = inlined_call_operand.vmem [shape: f32[32,32], index: 8, kind: input, shape index: {}]   ;;  %s910_s7 = inlined_call_operand.vmem [shape: f32[32,32], index: 7, kind: input, shape index: {}]   ;;  %s911_s11 = inlined_call_operand.vmem [shape: f32[32,32], index: 11, kind: output, shape index: {1}]   ;;  %s912_s10 = inlined_call_operand.vmem [shape: f32[32,32], index: 10, kind: output, shape index: {0}]   ;;  %s913_s9 = inlined_call_operand.vmem [shape: f32[1,32], index: 9, kind: input, shape index: {}]   ;;  %s914_s13 = inlined_call_operand.vmem [shape: f32[32,32], index: 13, kind: output, shape index: {3}]   ;;  %s915_s6 = inlined_call_operand.vmem [shape: f32[1,32], index: 6, kind: input, shape index: {}]   ;;  %s916_s12 = inlined_call_operand.vmem [shape: f32[32,32], index: 12, kind: output, shape index: {2}]  }
   0x1   :  { %v47_v0 = vld [vmem:[%s903_s3] sm:$0xff]  ;;  %v48_v1 = vld [vmem:[%s903_s3 + $0x8] sm:$0xff]  ;;  %v49_v2 = vld [vmem:[%s903_s3 + $0x10] sm:$0xff] }
   0x2   :  { %v628_v3 = vpack.c.bf16 %v48_v1, %v47_v0  ;;  %v50_v4 = vld [vmem:[%s903_s3 + $0x18] sm:$0xff]  ;;  %v43_v5 = vld [vmem:[%s904_s1] sm:$0xff]  ;;  %v44_v7 = vld [vmem:[%s904_s1 + $0x8] sm:$0xff] }
   0x3   :  { %v632_v6 = vpack.c.bf16 %v50_v4, %v49_v2  ;;  %580 = vmatprep.mubr.msk.f32.mxu0 %vm51_vm0, %v43_v5  ;;  %v45_v8 = vld [vmem:[%s904_s1 + $0x10] sm:$0xff]  ;;  %v46_v9 = vld [vmem:[%s904_s1 + $0x18] sm:$0xff]  ;;  %v164_v10 = vld [vmem:[%s905_s2] sm:$0xff] }
   0x4   :  { %629 = vmatprep.subr.bf16.mxu0 %v628_v3  ;;  %594 = vmatprep.mubr.msk.f32.mxu1 %vm51_vm0, %v164_v10  ;;  %v277_v11 = vld [vmem:[%s906_s5] sm:$0xff]  ;;  %v278_v12 = vld [vmem:[%s906_s5 + $0x8] sm:$0xff]  ;;  %v42_v21 = vld [vmem:[%s907_s0 + $0x18] sm:$0xff] }
   0x5   :  { %631 = vmatpush3.bf16.msra.mxu0 %v628_v3  ;;  %v644_v13 = vpack.c.bf16 %v278_v12, %v277_v11  ;;  %v40_v14 = vld [vmem:[%s907_s0 + $0x8] sm:$0xff]  ;;  %v39_v15 = vld [vmem:[%s907_s0] sm:$0xff]  ;;  %v41_v23 = vld [vmem:[%s907_s0 + $0x10] sm:$0xff] }
   0x6   :  { %633 = vmatprep.subr.bf16.mxu0 %v632_v6  ;;  %v525_v17 = vld [vmem:[%s908_s4] ss:$0 sm:$0xff]  ;;  %v394_v32 = vld [vmem:[%s909_s8 + $0x8] sm:$0xff]  ;;  %v166_v37 = vld [vmem:[%s905_s2 + $0x10] sm:$0xff] }
   0x7   :  { %v393_v31 = vld [vmem:[%s909_s8] sm:$0xff]  ;;  %v165_v36 = vld [vmem:[%s905_s2 + $0x8] sm:$0xff]  ;;  %v167_v38 = vld [vmem:[%s905_s2 + $0x18] sm:$0xff] }
   0x8   :  { %v652_v35 = vpack.c.bf16 %v394_v32, %v393_v31  ;;  %v395_v39 = vld [vmem:[%s909_s8 + $0x10] sm:$0xff]  ;;  %v396_v40 = vld [vmem:[%s909_s8 + $0x18] sm:$0xff]  ;;  %v389_v45 = vld [vmem:[%s910_s7] sm:$0xff] }
   0x9   :  { %635 = vmatpush3.bf16.msra.mxu0 %v632_v6  ;;  %v279_v41 = vld [vmem:[%s906_s5 + $0x10] sm:$0xff]  ;;  %v280_v42 = vld [vmem:[%s906_s5 + $0x18] sm:$0xff]  ;;  %v656_v43 = vpack.c.bf16 %v396_v40, %v395_v39  ;;  %v390_v46 = vld [vmem:[%s910_s7 + $0x8] sm:$0xff] }
   0xa   :  { %645 = vmatprep.subr.bf16.mxu0 %v644_v13  ;;  %v648_v44 = vpack.c.bf16 %v280_v42, %v279_v41  ;;  %v391_v47 = vld [vmem:[%s910_s7 + $0x10] sm:$0xff]  ;;  %v392_v48 = vld [vmem:[%s910_s7 + $0x18] sm:$0xff]  ;;  %v535_v57 = vld [vmem:[%s913_s9] ss:$0 sm:$0xff] }
   0xb   :  { %v530_v2 = vld [vmem:[%s915_s6] ss:$0 sm:$0xff] }
   0xc   :  { %581 = vmatmul.mubr.msk.f32.vlgmr.msra.gmra.mrb[0].mxu0 %vm51_vm0, %v44_v7 }
   0xd   :  { %583 = vmatprep.mubr.msk.f32.mxu0 %vm51_vm0, %v45_v8  ;;  %647 = vmatpush3.bf16.msra.mxu0 %v644_v13 }
   0xe   :  { %649 = vmatprep.subr.bf16.mxu0 %v648_v44 }
  0x10   :  { %584 = vmatmul.mubr.msk.f32.gmra.mrb[2].mxu0 %vm51_vm0, %v46_v9 }
  0x11   :  { %651 = vmatpush3.bf16.msra.mxu0 %v648_v44 }
  0xdf   :  { %v582_v16 = vpop.f32.mrb[0].mxu0 }
  0xe0   :  { %v150_v18 = vadd.f32 %v582_v16, %v40_v14  ;;  %v130_v19 = vpop.f32.mrb[1].mxu0 }
  0xe1   :  { %v149_v20 = vadd.f32 %v130_v19, %v39_v15 }
  0xe2   :  { %v161_v22 = vadd.f32 %v525_v17, %v150_v18 }
  0xe3   :  { %v160_v24 = vadd.f32 %v525_v17, %v149_v20  ;;  %v585_v25 = vpop.f32.mrb[2].mxu0 }
  0xe4   :  { %v152_v26 = vadd.f32 %v585_v25, %v42_v21  ;;  %v140_v27 = vpop.f32.mrb[3].mxu0 }
  0xe5   :  { %v151_v28 = vadd.f32 %v140_v27, %v41_v23  ;;  %v636_v29 = vpack.c.bf16 %v161_v22, %v160_v24 }
  0xe6   :  { %v163_v30 = vadd.f32 %v525_v17, %v152_v26 }
  0xe7   :  { %v162_v33 = vadd.f32 %v525_v17, %v151_v28  ;;  %637 = vmatprep.subr.bf16.mxu1 %v636_v29 }
  0xe8   :  { %639 = vmatpush3.bf16.msra.mxu1 %v636_v29 }
  0xe9   :  { %v640_v34 = vpack.c.bf16 %v163_v30, %v162_v33 }
  0xeb   :  { %641 = vmatprep.subr.bf16.mxu1 %v640_v34 }
  0xec   :  { %643 = vmatpush3.bf16.msra.mxu1 %v640_v34 }
  0xed   :  { %653 = vmatprep.subr.bf16.mxu1 %v652_v35 }
  0xef   :  { %595 = vmatmul.mubr.msk.f32.vlgmr.msra.gmra.mrb[0].mxu1 %vm51_vm0, %v165_v36 }
  0xf0   :  { %597 = vmatprep.mubr.msk.f32.mxu1 %vm51_vm0, %v166_v37  ;;  %655 = vmatpush3.bf16.msra.mxu1 %v652_v35 }
  0xf1   :  { %657 = vmatprep.subr.bf16.mxu1 %v656_v43 }
  0xf3   :  { %598 = vmatmul.mubr.msk.f32.gmra.mrb[2].mxu1 %vm51_vm0, %v167_v38 }
  0xf4   :  { %659 = vmatpush3.bf16.msra.mxu1 %v656_v43  ;;  %622 = vmatprep.mubr.msk.f32.mxu1 %vm51_vm0, %v389_v45 }
  0xf7   :  { %623 = vmatmul.mubr.msk.f32.vlgmr.msra.gmra.mrb[4].mxu1 %vm51_vm0, %v390_v46 }
  0xf8   :  { %625 = vmatprep.mubr.msk.f32.mxu1 %vm51_vm0, %v391_v47 }
  0xfb   :  { %626 = vmatmul.mubr.msk.f32.gmra.mrb[6].mxu1 %vm51_vm0, %v392_v48 }
 0x1c2   :  { %v596_v49 = vpop.f32.mrb[0].mxu1 }
 0x1c3   :  { %v266_v50 = vsub.f32 %v161_v22, %v596_v49  ;;  %274 = vst.msk [vmem:[%s911_s11 + $0x8] sm:$0xff] %vm51_vm0, %v596_v49  ;;  %v246_v51 = vpop.f32.mrb[1].mxu1 }
 0x1c4   :  { %v265_v52 = vsub.f32 %v160_v24, %v246_v51  ;;  %273 = vst.msk [vmem:[%s911_s11] sm:$0xff] %vm51_vm0, %v246_v51 }
 0x1c5   :  { %270 = vst.msk [vmem:[%s912_s10 + $0x8] sm:$0xff] %vm51_vm0, %v266_v50 }
 0x1c6   :  { %269 = vst.msk [vmem:[%s912_s10] sm:$0xff] %vm51_vm0, %v265_v52  ;;  %v599_v53 = vpop.f32.mrb[2].mxu1  ;;  %608 = vmatprep.mubr.msk.f32.mxu0 %vm51_vm0, %v265_v52 }
 0x1c7   :  { %v268_v54 = vsub.f32 %v163_v30, %v599_v53  ;;  %276 = vst.msk [vmem:[%s911_s11 + $0x18] sm:$0xff] %vm51_vm0, %v599_v53  ;;  %v256_v55 = vpop.f32.mrb[3].mxu1  ;;  %609 = vmatmul.mubr.msk.f32.vlgmr.msra.gmra.mrb[4].mxu0 %vm51_vm0, %v266_v50 }
 0x1c8   :  { %v267_v56 = vsub.f32 %v162_v33, %v256_v55  ;;  %275 = vst.msk [vmem:[%s911_s11 + $0x10] sm:$0xff] %vm51_vm0, %v256_v55 }
 0x1c9   :  { %272 = vst.msk [vmem:[%s912_s10 + $0x18] sm:$0xff] %vm51_vm0, %v268_v54 }
 0x1ca   :  { %271 = vst.msk [vmem:[%s912_s10 + $0x10] sm:$0xff] %vm51_vm0, %v267_v56  ;;  %611 = vmatprep.mubr.msk.f32.mxu0 %vm51_vm0, %v267_v56  ;;  %v624_v58 = vpop.f32.mrb[4].mxu1 }
 0x1cb   :  { %612 = vmatmul.mubr.msk.f32.gmra.mrb[6].mxu0 %vm51_vm0, %v268_v54  ;;  %v488_v59 = vadd.f32 %v624_v58, %v535_v57  ;;  %v482_v60 = vpop.f32.mrb[5].mxu1 }
 0x1cc   :  { %v483_v61 = vadd.f32 %v535_v57, %v482_v60 }
 0x1cd   :  { %502 = vst.msk [vmem:[%s914_s13 + $0x8] sm:$0xff] %vm51_vm0, %v488_v59 }
 0x1ce   :  { %501 = vst.msk [vmem:[%s914_s13] sm:$0xff] %vm51_vm0, %v483_v61  ;;  %v627_v62 = vpop.f32.mrb[6].mxu1 }
 0x1cf   :  { %v498_v63 = vadd.f32 %v627_v62, %v535_v57  ;;  %v492_v0 = vpop.f32.mrb[7].mxu1 }
 0x1d0   :  { %v493_v1 = vadd.f32 %v535_v57, %v492_v0 }
 0x1d1   :  { %504 = vst.msk [vmem:[%s914_s13 + $0x18] sm:$0xff] %vm51_vm0, %v498_v63 }
 0x1d2   :  { %503 = vst.msk [vmem:[%s914_s13 + $0x10] sm:$0xff] %vm51_vm0, %v493_v1 }
 0x29a   :  { %v610_v3 = vpop.f32.mrb[4].mxu0 }
 0x29b   :  { %v372_v4 = vadd.f32 %v610_v3, %v530_v2  ;;  %v366_v5 = vpop.f32.mrb[5].mxu0 }
 0x29c   :  { %v367_v6 = vadd.f32 %v530_v2, %v366_v5 }
 0x29d   :  { %386 = vst.msk [vmem:[%s916_s12 + $0x8] sm:$0xff] %vm51_vm0, %v372_v4 }
 0x29e   :  { %385 = vst.msk [vmem:[%s916_s12] sm:$0xff] %vm51_vm0, %v367_v6  ;;  %v613_v7 = vpop.f32.mrb[6].mxu0 }
 0x29f   :  { %v382_v8 = vadd.f32 %v613_v7, %v530_v2  ;;  %v376_v9 = vpop.f32.mrb[7].mxu0 }
 0x2a0   :  { %v377_v10 = vadd.f32 %v530_v2, %v376_v9 }
 0x2a1   :  { %388 = vst.msk [vmem:[%s916_s12 + $0x18] sm:$0xff] %vm51_vm0, %v382_v8 }
 0x2a2   :  { %387 = vst.msk [vmem:[%s916_s12 + $0x10] sm:$0xff] %vm51_vm0, %v377_v10 }

// kernel: reverse.11
= control target key start
LH: loop header
LB: loop body
LE: loop exit
PB: predicated region body
PF: predicated region fallthrough
CT: control target
= control target key end

     0   :  { %v2_v0 = vlaneseq  ;;  %s238_s0 = inlined_call_operand.vmem [shape: f32[2,8,4,7], index: 0, kind: input, shape index: {}]   ;;  %s239_s1 = inlined_call_operand.vmem [shape: f32[2,8,4,7], index: 1, kind: output, shape index: {}]  }
   0x1   :  { %v50_v2 = vld [vmem:[%s238_s0 + $0x10] sm:$0xff]  ;;  %v46_v3 = vld [vmem:[%s238_s0] sm:$0xff]  ;;  %v52_v4 = vld [vmem:[%s238_s0 + $0x18] sm:$0xff] }
   0x2   :  { %v3_v1 = vsub.s32 6, %v2_v0  ;;  %v48_v5 = vld [vmem:[%s238_s0 + $0x8] sm:$0xff]  ;;  %v54_v7 = vld [vmem:[%s238_s0 + $0x20] sm:$0xff]  ;;  %v60_v8 = vld [vmem:[%s238_s0 + $0x38] sm:$0xff] }
   0x3   :  { %v56_v6 = vld [vmem:[%s238_s0 + $0x28] sm:$0xff]  ;;  %v58_v9 = vld [vmem:[%s238_s0 + $0x30] sm:$0xff] }
   0x4   :  { %4 = vset.pattern.permute.xlu0 %v3_v1  ;;  %179 = vset.pattern.permute.xlu1 %v3_v1 }
   0x5   :  { %78 = vperm.xlu1 %179, %v50_v2   ;;  %66 = vperm.xlu0 %4, %v46_v3  }
   0x9   :  { %84 = vperm.xlu1 %179, %v52_v4   ;;  %72 = vperm.xlu0 %4, %v48_v5  }
   0xd   :  { %96 = vperm.xlu1 %179, %v56_v6   ;;  %90 = vperm.xlu0 %4, %v54_v7  }
  0x11   :  { %108 = vperm.xlu1 %179, %v60_v8   ;;  %102 = vperm.xlu0 %4, %v58_v9  }
  0x84   :  { %v79_v10 = vpop.permute.xlu1 %78  ;;  %v67_v11 = vpop.permute.xlu0 %66 }
  0x85   :  { %157 = vst [vmem:[%s239_s1 + $0x10] sm:$0xff] %v79_v10  ;;  %153 = vst [vmem:[%s239_s1] sm:$0xff] %v67_v11 }
  0x88   :  { %v85_v12 = vpop.permute.xlu1 %84  ;;  %v73_v13 = vpop.permute.xlu0 %72 }
  0x89   :  { %159 = vst [vmem:[%s239_s1 + $0x18] sm:$0xff] %v85_v12  ;;  %155 = vst [vmem:[%s239_s1 + $0x8] sm:$0xff] %v73_v13 }
  0x8c   :  { %v97_v14 = vpop.permute.xlu1 %96  ;;  %v91_v15 = vpop.permute.xlu0 %90 }
  0x8d   :  { %163 = vst [vmem:[%s239_s1 + $0x28] sm:$0xff] %v97_v14  ;;  %161 = vst [vmem:[%s239_s1 + $0x20] sm:$0xff] %v91_v15 }
  0x90   :  { %v109_v16 = vpop.permute.xlu1 %108  ;;  %v103_v17 = vpop.permute.xlu0 %102 }
  0x91   :  { %167 = vst [vmem:[%s239_s1 + $0x38] sm:$0xff] %v109_v16  ;;  %165 = vst [vmem:[%s239_s1 + $0x30] sm:$0xff] %v103_v17 }

// kernel: sub.17.clone
= control target key start
LH: loop header
LB: loop body
LE: loop exit
PB: predicated region body
PF: predicated region fallthrough
CT: control target
= control target key end

     0   :  { %s46_s0 = inlined_call_operand.vmem [shape: f32[2,4], index: 0, kind: input, shape index: {}]   ;;  %s47_s1 = inlined_call_operand.vmem [shape: f32[2,16,4], index: 1, kind: output, shape index: {}]  }
   0x1   :  { %v4_v0 = vld [vmem:[%s46_s0] ss:$0 sm:$0xff]  ;;  %v14_v1 = vld [vmem:[%s46_s0 + $0x1] ss:$0 sm:$0xff] }
   0x2   :  { %5 = vst [vmem:[%s47_s1] sm:$0xff] %v4_v0  ;;  %15 = vst [vmem:[%s47_s1 + $0x10] sm:$0xff] %v14_v1 }
   0x3   :  { %16 = vst [vmem:[%s47_s1 + $0x8] sm:$0xff] %v4_v0  ;;  %17 = vst [vmem:[%s47_s1 + $0x18] sm:$0xff] %v14_v1 }

// kernel: fedformer_forward.9
= control target key start
LH: loop header
LB: loop body
LE: loop exit
PB: predicated region body
PF: predicated region fallthrough
CT: control target
= control target key end

     0   :  { %vm103_vm0 = vcmask 261120   ;;  %vm417_vm1 = vcmask 523264   ;;  %vm1469_vm2 = vcmask 31744   ;;  %s2419_s4 = inlined_call_operand.vmem [shape: f32[32,32], index: 4, kind: input, shape index: {}]   ;;  %s2420_s1 = inlined_call_operand.vmem [shape: f32[32,32], index: 1, kind: input, shape index: {}]   ;;  %s2421_s3 = inlined_call_operand.vmem [shape: f32[32,32], index: 3, kind: input, shape index: {}]   ;;  %s2422_s6 = inlined_call_operand.vmem [shape: f32[32,64], index: 6, kind: input, shape index: {}]   ;;  %s2423_s0 = inlined_call_operand.vmem [shape: f32[32,32], index: 0, kind: input, shape index: {}]   ;;  %s2424_s5 = inlined_call_operand.vmem [shape: f32[1,32], index: 5, kind: input, shape index: {}]   ;;  %s2425_s7 = inlined_call_operand.vmem [shape: f32[64,32], index: 7, kind: input, shape index: {}]   ;;  %s2426_s11 = inlined_call_operand.vmem [shape: f32[32,4], index: 11, kind: input, shape index: {}]   ;;  %s2427_s8 = inlined_call_operand.vmem [shape: f32[32,32], index: 8, kind: input, shape index: {}]   ;;  %s2428_s2 = inlined_call_operand.vmem [shape: f32[32,32], index: 2, kind: input, shape index: {}]   ;;  %s2429_s9 = inlined_call_operand.vmem [shape: f32[32,32], index: 9, kind: input, shape index: {}]   ;;  %s2430_s10 = inlined_call_operand.vmem [shape: f32[32,4], index: 10, kind: input, shape index: {}]   ;;  %s2431_s12 = inlined_call_operand.vmem [shape: f32[32,4], index: 12, kind: input, shape index: {}]   ;;  %s2432_s16 = inlined_call_operand.vmem [shape: f32[32,32], index: 16, kind: input, shape index: {}]   ;;  %s2433_s14 = inlined_call_operand.vmem [shape: f32[1,32], index: 14, kind: input, shape index: {}]   ;;  %s2434_s15 = inlined_call_operand.vmem [shape: f32[1,32], index: 15, kind: input, shape index: {}]   ;;  %s2435_s17 = inlined_call_operand.vmem [shape: f32[32,4], index: 17, kind: input, shape index: {}]   ;;  %s2436_s19 = inlined_call_operand.vmem [shape: f32[1,4], index: 19, kind: input, shape index: {}]   ;;  %s2437_s13 = inlined_call_operand.vmem [shape: f32[32,4], index: 13, kind: input, shape index: {}]   ;;  %s2438_s18 = inlined_call_operand.vmem [shape: f32[1,4], index: 18, kind: input, shape index: {}]   ;;  %s2439_s20 = inlined_call_operand.vmem [shape: f32[1,4], index: 20, kind: input, shape index: {}]   ;;  %s2440_s22 = inlined_call_operand.vmem [shape: f32[32,4], index: 22, kind: input, shape index: {}]   ;;  %s2441_s21 = inlined_call_operand.vmem [shape: f32[32,4], index: 21, kind: input, shape index: {}]   ;;  %s2442_s23 = inlined_call_operand.vmem [shape: f32[32,4], index: 23, kind: output, shape index: {}]  }
   0x1   :  { %2450 = sst [smem:[#allocation2_spill]] %s2419_s4 }
   0x2   :  { %2451 = sst [smem:[#allocation3_spill]] %s2420_s1  ;;  %s2458_s24 = sld [smem:[#allocation2_spill]] }
   0x3   :  { %2452 = sst [smem:[#allocation4_spill]] %s2421_s3  ;;  %s2459_s28 = sld [smem:[#allocation3_spill]] }
   0x4   :  { %2453 = sst [smem:[#allocation5_spill]] %s2422_s6  ;;  %s2460_s1 = sld [smem:[#allocation4_spill]] }
   0x5   :  { %2454 = sst [smem:[#allocation6_spill]] %s2423_s0 }
   0x6   :  { %2455 = sst [smem:[#allocation7_spill]] %s2424_s5  ;;  %s2462_s6 = sld [smem:[#allocation6_spill]] }
   0x7   :  { %2456 = sst [smem:[#allocation8_spill]] %s2425_s7  ;;  %s2461_s7 = sld [smem:[#allocation5_spill]] }
   0x8   :  { %2457 = sst [smem:[#allocation9_spill]] %s2426_s11  ;;  %v82_v0 = vld [vmem:[%s2458_s24] sm:$0xff]  ;;  %v83_v1 = vld [vmem:[%s2458_s24 + $0x8] sm:$0xff]  ;;  %v84_v2 = vld [vmem:[%s2458_s24 + $0x10] sm:$0xff]  ;;  %s2463_s25 = sld [smem:[#allocation7_spill]] }
   0x9   :  { %v1807_v3 = vpack.c.bf16 %v83_v1, %v82_v0  ;;  %v85_v4 = vld [vmem:[%s2458_s24 + $0x18] sm:$0xff]  ;;  %v78_v5 = vld [vmem:[%s2459_s28] sm:$0xff]  ;;  %v79_v7 = vld [vmem:[%s2459_s28 + $0x8] sm:$0xff]  ;;  %s2464_s27 = sld [smem:[#allocation8_spill]] }
   0xa   :  { %v1811_v6 = vpack.c.bf16 %v85_v4, %v84_v2  ;;  %1639 = vmatprep.mubr.msk.f32.mxu0 %vm103_vm0, %v78_v5  ;;  %v80_v8 = vld [vmem:[%s2459_s28 + $0x10] sm:$0xff]  ;;  %v81_v9 = vld [vmem:[%s2459_s28 + $0x18] sm:$0xff]  ;;  %v2096_v10 = vld [vmem:[%s2460_s1] sm:$0xff]  ;;  %s2465_s28 = sld [smem:[#allocation9_spill]] }
   0xb   :  { %1808 = vmatprep.subr.bf16.mxu0 %v1807_v3  ;;  %1653 = vmatprep.mubr.msk.f32.mxu1 %vm103_vm0, %v2096_v10  ;;  %v2124_v33 = vld [vmem:[%s2460_s1 + $0x8] sm:$0xff]  ;;  %v2129_v34 = vld [vmem:[%s2460_s1 + $0x10] sm:$0xff]  ;;  %v2138_v35 = vld [vmem:[%s2460_s1 + $0x18] sm:$0xff] }
   0xc   :  { %1810 = vmatpush3.bf16.msra.mxu0 %v1807_v3  ;;  %v75_v14 = vld [vmem:[%s2462_s6 + $0x8] sm:$0xff]  ;;  %v74_v15 = vld [vmem:[%s2462_s6] sm:$0xff]  ;;  %v77_v21 = vld [vmem:[%s2462_s6 + $0x18] sm:$0xff] }
   0xd   :  { %1812 = vmatprep.subr.bf16.mxu0 %v1811_v6  ;;  %v91_v11 = vld [vmem:[%s2461_s7] sm:$0xff]  ;;  %v92_v12 = vld [vmem:[%s2461_s7 + $0x8] sm:$0xff]  ;;  %v76_v23 = vld [vmem:[%s2462_s6 + $0x10] sm:$0xff] }
   0xe   :  { %v1823_v13 = vpack.c.bf16 %v92_v12, %v91_v11  ;;  %v1482_v16 = vld [vmem:[%s2463_s25] ss:$0 sm:$0xff]  ;;  %v93_v36 = vld [vmem:[%s2461_s7 + $0x10] sm:$0xff]  ;;  %v94_v37 = vld [vmem:[%s2461_s7 + $0x18] sm:$0xff] }
   0xf   :  { %v1827_v38 = vpack.c.bf16 %v94_v37, %v93_v36  ;;  %v95_v39 = vld [vmem:[%s2464_s27] sm:$0xff]  ;;  %v96_v40 = vld [vmem:[%s2464_s27 + $0x8] sm:$0xff]  ;;  %v97_v41 = vld [vmem:[%s2464_s27 + $0x10] sm:$0xff] }
  0x10   :  { %1814 = vmatpush3.bf16.msra.mxu0 %v1811_v6  ;;  %v1831_v42 = vpack.c.bf16 %v96_v40, %v95_v39  ;;  %v98_v43 = vld [vmem:[%s2464_s27 + $0x18] sm:$0xff]  ;;  %v99_v45 = vld [vmem:[%s2464_s27 + $0x20] sm:$0xff]  ;;  %v100_v46 = vld [vmem:[%s2464_s27 + $0x28] sm:$0xff] }
  0x11   :  { %1824 = vmatprep.subr.bf16.mxu0 %v1823_v13  ;;  %v1835_v44 = vpack.c.bf16 %v98_v43, %v97_v41  ;;  %v1839_v47 = vpack.c.bf16 %v100_v46, %v99_v45  ;;  %v101_v56 = vld [vmem:[%s2464_s27 + $0x30] sm:$0xff]  ;;  %v102_v57 = vld [vmem:[%s2464_s27 + $0x38] sm:$0xff]  ;;  %v636_v3 = vld [vmem:[%s2465_s28] sm:$0xff] }
  0x12   :  { %v1843_v58 = vpack.c.bf16 %v102_v57, %v101_v56  ;;  %v637_v4 = vld [vmem:[%s2465_s28 + $0x8] sm:$0xff]  ;;  %v626_v46 = vld [vmem:[%s2427_s8 + $0x10] sm:$0xff]  ;;  %v640_v57 = vld [vmem:[%s2431_s12] sm:$0xff] }
  0x13   :  { %1640 = vmatmul.mubr.msk.f32.vlgmr.msra.gmra.mrb[0].mxu0 %vm103_vm0, %v79_v7  ;;  %v1863_v5 = vpack.c.bf16 %v637_v4, %v636_v3  ;;  %v625_v45 = vld [vmem:[%s2427_s8 + $0x8] sm:$0xff] }
  0x14   :  { %1642 = vmatprep.mubr.msk.f32.mxu0 %vm103_vm0, %v80_v8  ;;  %1826 = vmatpush3.bf16.msra.mxu0 %v1823_v13 }
  0x15   :  { %1828 = vmatprep.subr.bf16.mxu0 %v1827_v38 }
  0x17   :  { %1643 = vmatmul.mubr.msk.f32.gmra.mrb[2].mxu0 %vm103_vm0, %v81_v9 }
  0x18   :  { %1830 = vmatpush3.bf16.msra.mxu0 %v1827_v38 }
  0xe6   :  { %v1641_v17 = vpop.f32.mrb[0].mxu0 }
  0xe7   :  { %v202_v18 = vadd.f32 %v1641_v17, %v75_v14  ;;  %v182_v19 = vpop.f32.mrb[1].mxu0  ;;  %v639_v17 = vld [vmem:[%s2465_s28 + $0x18] sm:$0xff] }
  0xe8   :  { %v201_v20 = vadd.f32 %v182_v19, %v74_v15  ;;  %v624_v19 = vld [vmem:[%s2427_s8] sm:$0xff] }
  0xe9   :  { %v212_v22 = vadd.f32 %v1482_v16, %v202_v18 }
  0xea   :  { %v211_v24 = vadd.f32 %v1482_v16, %v201_v20  ;;  %v1644_v25 = vpop.f32.mrb[2].mxu0  ;;  %v609_v20 = vld [vmem:[%s2428_s2 + $0x8] sm:$0xff] }
  0xeb   :  { %v204_v26 = vadd.f32 %v1644_v25, %v77_v21  ;;  %v192_v27 = vpop.f32.mrb[3].mxu0  ;;  %v608_v21 = vld [vmem:[%s2428_s2] sm:$0xff] }
  0xec   :  { %v203_v28 = vadd.f32 %v192_v27, %v76_v23  ;;  %v1815_v29 = vpack.c.bf16 %v212_v22, %v211_v24 }
  0xed   :  { %v214_v30 = vadd.f32 %v1482_v16, %v204_v26  ;;  %v610_v26 = vld [vmem:[%s2428_s2 + $0x10] sm:$0xff] }
  0xee   :  { %v213_v31 = vadd.f32 %v1482_v16, %v203_v28  ;;  %1816 = vmatprep.subr.bf16.mxu1 %v1815_v29  ;;  %v638_v16 = vld [vmem:[%s2465_s28 + $0x10] sm:$0xff] }
  0xef   :  { %1818 = vmatpush3.bf16.msra.mxu1 %v1815_v29  ;;  %v1867_v18 = vpack.c.bf16 %v639_v17, %v638_v16  ;;  %v630_v16 = vld [vmem:[%s2429_s9 + $0x10] sm:$0xff]  ;;  %v631_v17 = vld [vmem:[%s2429_s9 + $0x18] sm:$0xff] }
  0xf0   :  { %v1819_v32 = vpack.c.bf16 %v214_v30, %v213_v31 }
  0xf2   :  { %1820 = vmatprep.subr.bf16.mxu1 %v1819_v32 }
  0xf3   :  { %1822 = vmatpush3.bf16.msra.mxu1 %v1819_v32 }
  0xf4   :  { %1832 = vmatprep.subr.bf16.mxu1 %v1831_v42 }
  0xf6   :  { %1654 = vmatmul.mubr.msk.f32.vlgmr.msra.gmra.mrb[0].mxu1 %vm103_vm0, %v2124_v33 }
  0xf7   :  { %1656 = vmatprep.mubr.msk.f32.mxu1 %vm103_vm0, %v2129_v34  ;;  %1834 = vmatpush3.bf16.msra.mxu1 %v1831_v42 }
  0xf8   :  { %1836 = vmatprep.subr.bf16.mxu1 %v1835_v44 }
  0xfa   :  { %1657 = vmatmul.mubr.msk.f32.gmra.mrb[2].mxu1 %vm103_vm0, %v2138_v35 }
  0xfb   :  { %1838 = vmatpush3.bf16.msra.mxu1 %v1835_v44 }
  0xfc   :  { %1840 = vmatprep.subr.bf16.mxu1 %v1839_v47 }
  0xff   :  { %1842 = vmatpush3.bf16.msra.mxu1 %v1839_v47 }
 0x100   :  { %1844 = vmatprep.subr.bf16.mxu1 %v1843_v58 }
 0x103   :  { %1846 = vmatpush3.bf16.msra.mxu1 %v1843_v58  ;;  %v641_v58 = vld [vmem:[%s2431_s12 + $0x8] sm:$0xff] }
 0x104   :  { %1864 = vmatprep.subr.bf16.mxu1 %v1863_v5 }
 0x1c9   :  { %v2166_v48 = vpop.f32.mrb[0].mxu1 }
 0x1ca   :  { %v2168_v49 = vpop.f32.mrb[1].mxu1  ;;  %v313_v51 = vsub.f32 %v212_v22, %v2166_v48  ;;  %v613_v22 = vadd.f32 %v2166_v48, %v609_v20  ;;  %v627_v48 = vld [vmem:[%s2427_s8 + $0x18] sm:$0xff] }
 0x1cb   :  { %v312_v50 = vsub.f32 %v211_v24, %v2168_v49  ;;  %v612_v23 = vadd.f32 %v608_v21, %v2168_v49  ;;  %v611_v24 = vld [vmem:[%s2428_s2 + $0x18] sm:$0xff]  ;;  %v628_v49 = vld [vmem:[%s2429_s9] sm:$0xff] }
 0x1cc   :  { %v643_v20 = vld [vmem:[%s2431_s12 + $0x18] sm:$0xff] }
 0x1cd   :  { %v2172_v52 = vpop.f32.mrb[2].mxu1  ;;  %1667 = vmatprep.mubr.msk.f32.mxu0 %vm103_vm0, %v312_v50 }
 0x1ce   :  { %v2175_v53 = vpop.f32.mrb[3].mxu1  ;;  %1668 = vmatmul.mubr.msk.f32.vlgmr.msra.gmra.mrb[4].mxu0 %vm103_vm0, %v313_v51  ;;  %v315_v55 = vsub.f32 %v214_v30, %v2172_v52 }
 0x1cf   :  { %v314_v54 = vsub.f32 %v213_v31, %v2175_v53  ;;  %v615_v31 = vadd.f32 %v2172_v52, %v611_v24  ;;  %v614_v32 = vadd.f32 %v610_v26, %v2175_v53  ;;  %v633_v52 = vld [vmem:[%s2430_s10 + $0x8] sm:$0xff]  ;;  %v634_v53 = vld [vmem:[%s2430_s10 + $0x10] sm:$0xff] }
 0x1d1   :  { %1670 = vmatprep.mubr.msk.f32.mxu0 %vm103_vm0, %v314_v54 }
 0x1d2   :  { %1671 = vmatmul.mubr.msk.f32.gmra.mrb[6].mxu0 %vm103_vm0, %v315_v55 }
 0x1d3   :  { %1703 = vmatprep.mubr.msk.f32.mxu0 %vm103_vm0, %v2096_v10 }
 0x2a1   :  { %v1669_v59 = vpop.f32.mrb[4].mxu0 }
 0x2a2   :  { %v394_v60 = vpop.f32.mrb[5].mxu0  ;;  %v414_v62 = vmax.f32 %v1669_v59, 0.0  ;;  %v1887_v59 = vpack.c.bf16 %v641_v58, %v640_v57  ;;  %v1317_v57 = vld [vmem:[%s2435_s17] sm:$0xff]  ;;  %v1318_v58 = vld [vmem:[%s2435_s17 + $0x8] sm:$0xff] }
 0x2a3   :  { %v413_v61 = vmax.f32 %v394_v60, 0.0 }
 0x2a5   :  { %v1672_v63 = vpop.f32.mrb[6].mxu0  ;;  %1689 = vmatprep.mubr.msk.f32.mxu1 %vm417_vm1, %v413_v61 }
 0x2a6   :  { %v404_v0 = vpop.f32.mrb[7].mxu0  ;;  %1690 = vmatmul.mubr.msk.f32.vlgmr.msra.gmra.mrb[4].mxu1 %vm417_vm1, %v414_v62  ;;  %v416_v2 = vmax.f32 %v1672_v63, 0.0 }
 0x2a7   :  { %v415_v1 = vmax.f32 %v404_v0, 0.0  ;;  %1866 = vmatpush3.bf16.msra.mxu1 %v1863_v5 }
 0x2a8   :  { %1868 = vmatprep.subr.bf16.mxu1 %v1867_v18 }
 0x2a9   :  { %1692 = vmatprep.mubr.msk.f32.mxu1 %vm417_vm1, %v415_v1 }
 0x2aa   :  { %1693 = vmatmul.mubr.msk.f32.gmra.mrb[6].mxu1 %vm417_vm1, %v416_v2 }
 0x2ab   :  { %1870 = vmatpush3.bf16.msra.mxu1 %v1867_v18  ;;  %v1139_v18 = vld [vmem:[%s2432_s16] sm:$0xff] }
 0x379   :  { %v1691_v6 = vpop.f32.mrb[4].mxu1 }
 0x37a   :  { %v516_v7 = vadd.f32 %v1691_v6, %v313_v51  ;;  %v496_v8 = vpop.f32.mrb[5].mxu1  ;;  %v632_v51 = vld [vmem:[%s2430_s10] sm:$0xff] }
 0x37b   :  { %v515_v9 = vadd.f32 %v496_v8, %v312_v50  ;;  %v629_v50 = vld [vmem:[%s2429_s9 + $0x8] sm:$0xff] }
 0x37d   :  { %v1847_v10 = vpack.c.bf16 %v516_v7, %v515_v9  ;;  %v1694_v11 = vpop.f32.mrb[6].mxu1 }
 0x37e   :  { %v518_v12 = vadd.f32 %v1694_v11, %v315_v55  ;;  %v506_v13 = vpop.f32.mrb[7].mxu1  ;;  %v635_v55 = vld [vmem:[%s2430_s10 + $0x18] sm:$0xff] }
 0x37f   :  { %v517_v14 = vadd.f32 %v506_v13, %v314_v54  ;;  %1848 = vmatprep.subr.bf16.mxu0 %v1847_v10  ;;  %v1871_v54 = vpack.c.bf16 %v633_v52, %v632_v51  ;;  %v1875_v56 = vpack.c.bf16 %v635_v55, %v634_v53 }
 0x380   :  { %1850 = vmatpush3.bf16.msra.mxu0 %v1847_v10 }
 0x381   :  { %v1851_v15 = vpack.c.bf16 %v518_v12, %v517_v14  ;;  %1872 = vmatprep.subr.bf16.mxu1 %v1871_v54 }
 0x383   :  { %1852 = vmatprep.subr.bf16.mxu0 %v1851_v15 }
 0x384   :  { %1854 = vmatpush3.bf16.msra.mxu0 %v1851_v15 }
 0x387   :  { %1704 = vmatmul.mubr.msk.f32.vlgmr.msra.gmra.mrb[8].mxu0 %vm103_vm0, %v2124_v33 }
 0x388   :  { %1706 = vmatprep.mubr.msk.f32.mxu0 %vm103_vm0, %v2129_v34 }
 0x38b   :  { %1707 = vmatmul.mubr.msk.f32.gmra.mrb[10].mxu0 %vm103_vm0, %v2138_v35 }
 0x38c   :  { %1717 = vmatprep.mubr.msk.f32.mxu0 %vm103_vm0, %v624_v19  ;;  %v642_v19 = vld [vmem:[%s2431_s12 + $0x10] sm:$0xff] }
 0x45a   :  { %v1705_v25 = vpop.f32.mrb[8].mxu0 }
 0x45b   :  { %v617_v27 = vadd.f32 %v1705_v25, %v613_v22  ;;  %v585_v28 = vpop.f32.mrb[9].mxu0  ;;  %v2228_v33 = vsub.f32 %v516_v7, %v1705_v25 }
 0x45c   :  { %v616_v29 = vadd.f32 %v612_v23, %v585_v28  ;;  %v604_v30 = vsub.f32 %v515_v9, %v585_v28  ;;  %v1891_v23 = vpack.c.bf16 %v643_v20, %v642_v19  ;;  %v1440_v19 = vld [vmem:[%s2436_s19] sm:$0x1] }
 0x45d   :  { %v1146_v42 = vsel %vm103_vm0, %v2228_v33, 0.0  ;;  %v1441_v20 = vadd.f32 1e-10, %v1440_v19 }
 0x45e   :  { %v1855_v34 = vpack.c.bf16 %v617_v27, %v616_v29  ;;  %v1708_v35 = vpop.f32.mrb[10].mxu0  ;;  %1731 = vmatprep.mubr.msk.f32.mxu1 %vm103_vm0, %v616_v29  ;;  %v1143_v36 = vsel %vm103_vm0, %v604_v30, 0.0 }
 0x45f   :  { %v619_v37 = vadd.f32 %v1708_v35, %v615_v31  ;;  %1732 = vmatmul.mubr.msk.f32.vlgmr.msra.gmra.mrb[8].mxu1 %vm103_vm0, %v617_v27  ;;  %1144 = vadd.xlane.f32.xlu0 %v1143_v36  ;;  %v595_v38 = vpop.f32.mrb[11].mxu0  ;;  %v607_v44 = vsub.f32 %v518_v12, %v1708_v35 }
 0x460   :  { %v618_v39 = vadd.f32 %v614_v32, %v595_v38  ;;  %1856 = vmatprep.subr.bf16.mxu0 %v1855_v34  ;;  %v606_v40 = vsub.f32 %v517_v14, %v595_v38  ;;  %1874 = vmatpush3.bf16.msra.mxu1 %v1871_v54 }
 0x461   :  { %1858 = vmatpush3.bf16.msra.mxu0 %v1855_v34  ;;  %v1152_v47 = vsel %vm103_vm0, %v607_v44, 0.0  ;;  %1876 = vmatprep.subr.bf16.mxu1 %v1875_v56 }
 0x462   :  { %v1859_v41 = vpack.c.bf16 %v619_v37, %v618_v39  ;;  %1734 = vmatprep.mubr.msk.f32.mxu1 %vm103_vm0, %v618_v39  ;;  %v1149_v43 = vsel %vm103_vm0, %v606_v40, 0.0 }
 0x463   :  { %1147 = vadd.xlane.f32.xlu0 %v1146_v42  ;;  %1735 = vmatmul.mubr.msk.f32.gmra.mrb[10].mxu1 %vm103_vm0, %v619_v37  ;;  %v1519_v42 = vld [vmem:[%s2433_s14] ss:$0 sm:$0xff] }
 0x464   :  { %1150 = vadd.xlane.f32.xlu1 %v1149_v43  ;;  %1860 = vmatprep.subr.bf16.mxu0 %v1859_v41 }
 0x465   :  { %1862 = vmatpush3.bf16.msra.mxu0 %v1859_v41  ;;  %1878 = vmatpush3.bf16.msra.mxu1 %v1875_v56 }
 0x466   :  { %1880 = vmatprep.subr.bf16.mxu0 %v1855_v34  ;;  %1888 = vmatprep.subr.bf16.mxu1 %v1887_v59 }
 0x468   :  { %1153 = vadd.xlane.f32.xlu1 %v1152_v47  ;;  %1718 = vmatmul.mubr.msk.f32.vlgmr.msra.gmra.mrb[12].mxu0 %vm103_vm0, %v625_v45  ;;  %v1520_v47 = vld [vmem:[%s2434_s15] ss:$0 sm:$0xff] }
 0x469   :  { %1882 = vmatpush3.bf16.msra.mxu0 %v1855_v34  ;;  %1720 = vmatprep.mubr.msk.f32.mxu0 %vm103_vm0, %v626_v46 }
 0x46a   :  { %1884 = vmatprep.subr.bf16.mxu0 %v1859_v41 }
 0x46c   :  { %1721 = vmatmul.mubr.msk.f32.gmra.mrb[14].mxu0 %vm103_vm0, %v627_v48 }
 0x46d   :  { %1886 = vmatpush3.bf16.msra.mxu0 %v1859_v41  ;;  %1759 = vmatprep.mubr.msk.f32.mxu0 %vm103_vm0, %v628_v49 }
 0x470   :  { %1760 = vmatmul.mubr.msk.f32.vlgmr.msra.gmra.mrb[16].mxu0 %vm103_vm0, %v629_v50 }
 0x471   :  { %1762 = vmatprep.mubr.msk.f32.mxu0 %vm103_vm0, %v630_v16 }
 0x474   :  { %1763 = vmatmul.mubr.msk.f32.gmra.mrb[18].mxu0 %vm103_vm0, %v631_v17  ;;  %v1443_v17 = vlaneseq }
 0x475   :  { %1787 = vmatprep.mubr.msk.f32.mxu0 %vm103_vm0, %v1139_v18 }
 0x476   :  { %v1444_v18 = vshrl.u32 %v1443_v17, 7 }
 0x4ec   :  { %v1145_v60 = vpop.xlane.xlu0 %1144 }
 0x4ed   :  { %v1156_v61 = vmul.f32 0.03125, %v1145_v60 }
 0x4ef   :  { %v2277_v62 = vsub.f32 %v604_v30, %v1156_v61 }
 0x4f0   :  { %v1148_v63 = vpop.xlane.xlu0 %1147 }
 0x4f1   :  { %v1157_v0 = vmul.f32 0.03125, %v1148_v63  ;;  %v1151_v1 = vpop.xlane.xlu1 %1150  ;;  %v1164_v2 = vmul.f32 %v2277_v62, %v2277_v62  ;;  %v1140_v63 = vld [vmem:[%s2432_s16 + $0x8] sm:$0xff] }
 0x4f2   :  { %v1158_v3 = vmul.f32 0.03125, %v1151_v1  ;;  %v1142_v1 = vld [vmem:[%s2432_s16 + $0x18] sm:$0xff] }
 0x4f3   :  { %v2282_v4 = vsub.f32 %v2228_v33, %v1157_v0  ;;  %v1168_v5 = vsel %vm103_vm0, %v1164_v2, 0.0  ;;  %v1141_v0 = vld [vmem:[%s2432_s16 + $0x10] sm:$0xff] }
 0x4f4   :  { %v2285_v6 = vsub.f32 %v606_v40, %v1158_v3  ;;  %1169 = vadd.xlane.f32.xlu0 %v1168_v5  ;;  %v1320_v5 = vld [vmem:[%s2435_s17 + $0x18] sm:$0xff] }
 0x4f5   :  { %v1154_v7 = vpop.xlane.xlu1 %1153  ;;  %v1165_v8 = vmul.f32 %v2282_v4, %v2282_v4 }
 0x4f6   :  { %v1159_v9 = vmul.f32 0.03125, %v1154_v7  ;;  %v1166_v10 = vmul.f32 %v2285_v6, %v2285_v6 }
 0x4f7   :  { %v1171_v11 = vsel %vm103_vm0, %v1165_v8, 0.0 }
 0x4f8   :  { %v2292_v12 = vsub.f32 %v607_v44, %v1159_v9  ;;  %1172 = vadd.xlane.f32.xlu1 %v1171_v11  ;;  %v1174_v13 = vsel %vm103_vm0, %v1166_v10, 0.0 }
 0x4f9   :  { %1175 = vadd.xlane.f32.xlu0 %v1174_v13 }
 0x4fa   :  { %v1167_v14 = vmul.f32 %v2292_v12, %v2292_v12 }
 0x4fc   :  { %v1177_v15 = vsel %vm103_vm0, %v1167_v14, 0.0 }
 0x4fd   :  { %1178 = vadd.xlane.f32.xlu1 %v1177_v15 }
 0x53b   :  { %v1719_v21 = vpop.f32.mrb[12].mxu0 }
 0x53c   :  { %v722_v22 = vpop.f32.mrb[13].mxu0 }
 0x53d   :  { %1745 = vmatprep.mubr.msk.f32.mxu1 %vm103_vm0, %v722_v22 }
 0x53e   :  { %1746 = vmatmul.mubr.msk.f32.vlgmr.msra.gmra.mrb[8].mxu1 %vm103_vm0, %v1719_v21  ;;  %v1445_v21 = vsub.s32 0, %v1444_v18 }
 0x53f   :  { %v1722_v24 = vpop.f32.mrb[14].mxu0  ;;  %1890 = vmatpush3.bf16.msra.mxu1 %v1887_v59  ;;  %v1903_v59 = vpack.c.bf16 %v1318_v58, %v1317_v57  ;;  %v1455_v57 = vld [vmem:[%s2440_s22 + $0x10] sm:$0xff] }
 0x540   :  { %v732_v25 = vpop.f32.mrb[15].mxu0  ;;  %1892 = vmatprep.subr.bf16.mxu1 %v1891_v23  ;;  %v1446_v22 = vrot.slane %v1441_v20, %v1445_v21 }
 0x541   :  { %1748 = vmatprep.mubr.msk.f32.mxu1 %vm103_vm0, %v732_v25  ;;  %v1525_v25 = vld [vmem:[%s2438_s18] ss:$0 sm:$0xff] }
 0x542   :  { %1749 = vmatmul.mubr.msk.f32.gmra.mrb[10].mxu1 %vm103_vm0, %v1722_v24  ;;  %v620_v24 = vld [vmem:[%s2437_s13] sm:$0xff] }
 0x543   :  { %v1761_v26 = vpop.f32.mrb[16].mxu0  ;;  %1894 = vmatpush3.bf16.msra.mxu1 %v1891_v23  ;;  %v621_v23 = vld [vmem:[%s2437_s13 + $0x8] sm:$0xff] }
 0x544   :  { %v1013_v27 = vpop.f32.mrb[17].mxu0  ;;  %1911 = vmatprep.subr.bf16.mxu1 %v1903_v59 }
 0x545   :  { %1773 = vmatprep.mubr.msk.f32.mxu1 %vm103_vm0, %v1013_v27 }
 0x546   :  { %1774 = vmatmul.mubr.msk.f32.vlgmr.msra.gmra.mrb[8].mxu1 %vm103_vm0, %v1761_v26  ;;  %v623_v26 = vld [vmem:[%s2437_s13 + $0x18] sm:$0xff] }
 0x547   :  { %1913 = vmatpush3.bf16.msra.mxu1 %v1903_v59  ;;  %v1764_v2 = vpop.f32.mrb[18].mxu0 }
 0x548   :  { %v1023_v3 = vpop.f32.mrb[19].mxu0 }
 0x549   :  { %1776 = vmatprep.mubr.msk.f32.mxu1 %vm103_vm0, %v1023_v3 }
 0x54a   :  { %1777 = vmatmul.mubr.msk.f32.gmra.mrb[10].mxu1 %vm103_vm0, %v1764_v2 }
 0x581   :  { %v1170_v28 = vpop.xlane.xlu0 %1169 }
 0x582   :  { %v1180_v29 = vmul.f32 0.03125, %v1170_v28  ;;  %v622_v28 = vld [vmem:[%s2437_s13 + $0x10] sm:$0xff] }
 0x584   :  { %v1184_v30 = vadd.f32 1e-05, %v1180_v29 }
 0x585   :  { %v1173_v31 = vpop.xlane.xlu1 %1172 }
 0x586   :  { %1935 = vrsqrt.f32 %v1184_v30  ;;  %v1176_v32 = vpop.xlane.xlu0 %1175  ;;  %v1181_v33 = vmul.f32 0.03125, %v1173_v31 }
 0x587   :  { %v1182_v34 = vmul.f32 0.03125, %v1176_v32 }
 0x588   :  { %v1185_v35 = vadd.f32 1e-05, %v1181_v33  ;;  %v1921_v33 = vadd.f32 %v1525_v25, %v623_v26 }
 0x589   :  { %v1186_v36 = vadd.f32 1e-05, %v1182_v34  ;;  %v1530_v34 = vld [vmem:[%s2439_s20] ss:$0 sm:$0xff] }
 0x58a   :  { %1937 = vrsqrt.f32 %v1185_v35  ;;  %v1179_v37 = vpop.xlane.xlu1 %1178 }
 0x58b   :  { %1939 = vrsqrt.f32 %v1186_v36  ;;  %v1183_v38 = vmul.f32 0.03125, %v1179_v37  ;;  %v1923_v36 = vadd.f32 %v1525_v25, %v622_v28 }
 0x58d   :  { %v1187_v39 = vadd.f32 1e-05, %v1183_v38 }
 0x58f   :  { %1941 = vrsqrt.f32 %v1187_v39 }
 0x590   :  { %v1936_v40 = vpop.eup %1935  ;;  %1943 = vrcp.f32 %v1446_v22 }
 0x591   :  { %v1192_v41 = vmul.f32 %v1936_v40, %v2277_v62 }
 0x593   :  { %v1202_v46 = vmul.f32 %v1519_v42, %v1192_v41 }
 0x594   :  { %v1938_v43 = vpop.eup %1937 }
 0x595   :  { %v1940_v44 = vpop.eup %1939  ;;  %v1193_v45 = vmul.f32 %v1938_v43, %v2282_v4  ;;  %v1212_v51 = vadd.f32 %v1520_v47, %v1202_v46  ;;  %v1319_v4 = vld [vmem:[%s2435_s17 + $0x10] sm:$0xff] }
 0x596   :  { %v1194_v48 = vmul.f32 %v1940_v44, %v2285_v6  ;;  %v1907_v6 = vpack.c.bf16 %v1320_v5, %v1319_v4  ;;  %v1454_v44 = vld [vmem:[%s2440_s22 + $0x8] sm:$0xff] }
 0x597   :  { %v1203_v49 = vmul.f32 %v1519_v42, %v1193_v45 }
 0x598   :  { %v1204_v54 = vmul.f32 %v1519_v42, %v1194_v48  ;;  %1912 = vmatprep.subr.bf16.mxu1 %v1907_v6  ;;  %v1453_v48 = vld [vmem:[%s2440_s22] sm:$0xff] }
 0x599   :  { %v1942_v50 = vpop.eup %1941  ;;  %v1213_v52 = vadd.f32 %v1520_v47, %v1203_v49  ;;  %1914 = vmatpush3.bf16.msra.mxu1 %v1907_v6 }
 0x59a   :  { %v1195_v53 = vmul.f32 %v1942_v50, %v2292_v12  ;;  %v1214_v60 = vadd.f32 %v1520_v47, %v1204_v54  ;;  %v1944_v38 = vpop.eup %1943  ;;  %v1462_v50 = vld [vmem:[%s2441_s21 + $0x8] sm:$0xff] }
 0x59b   :  { %v1895_v55 = vpack.c.bf16 %v1213_v52, %v1212_v51 }
 0x59c   :  { %v1205_v56 = vmul.f32 %v1519_v42, %v1195_v53 }
 0x59d   :  { %1896 = vmatprep.subr.bf16.mxu0 %v1895_v55 }
 0x59e   :  { %1898 = vmatpush3.bf16.msra.mxu0 %v1895_v55  ;;  %v1215_v61 = vadd.f32 %v1520_v47, %v1205_v56  ;;  %v1461_v55 = vld [vmem:[%s2441_s21] sm:$0xff] }
 0x5a0   :  { %v1899_v62 = vpack.c.bf16 %v1215_v61, %v1214_v60 }
 0x5a2   :  { %1900 = vmatprep.subr.bf16.mxu0 %v1899_v62 }
 0x5a3   :  { %1902 = vmatpush3.bf16.msra.mxu0 %v1899_v62 }
 0x5a4   :  { %1904 = vmatprep.subr.bf16.mxu0 %v1903_v59 }
 0x5a6   :  { %1788 = vmatmul.mubr.msk.f32.vlgmr.msra.gmra.mrb[20].mxu0 %vm103_vm0, %v1140_v63  ;;  %v1463_v63 = vld [vmem:[%s2441_s21 + $0x10] sm:$0xff] }
 0x5a7   :  { %1790 = vmatprep.mubr.msk.f32.mxu0 %vm103_vm0, %v1141_v0  ;;  %1906 = vmatpush3.bf16.msra.mxu0 %v1903_v59  ;;  %v1464_v59 = vld [vmem:[%s2441_s21 + $0x18] sm:$0xff] }
 0x5a8   :  { %1908 = vmatprep.subr.bf16.mxu0 %v1907_v6 }
 0x5aa   :  { %1791 = vmatmul.mubr.msk.f32.gmra.mrb[22].mxu0 %vm103_vm0, %v1142_v1 }
 0x5ab   :  { %1910 = vmatpush3.bf16.msra.mxu0 %v1907_v6 }
 0x619   :  { %v1775_v7 = vpop.f32.mrb[8].mxu1 }
 0x61a   :  { %v1110_v8 = vpop.f32.mrb[9].mxu1  ;;  %v1915_v27 = vadd.f32 %v1775_v7, %v621_v23 }
 0x61b   :  { %v1918_v29 = vadd.f32 %v1110_v8, %v620_v24 }
 0x679   :  { %v1789_v9 = vpop.f32.mrb[20].mxu0 }
 0x67a   :  { %v1294_v10 = vpop.f32.mrb[21].mxu0  ;;  %v1314_v12 = vsub.f32 %v1213_v52, %v1789_v9  ;;  %v1456_v52 = vld [vmem:[%s2440_s22 + $0x18] sm:$0xff] }
 0x67b   :  { %v1313_v11 = vsub.f32 %v1212_v51, %v1294_v10 }
 0x67d   :  { %v1792_v13 = vpop.f32.mrb[22].mxu0  ;;  %1801 = vmatprep.mubr.msk.f32.mxu0 %vm103_vm0, %v1313_v11 }
 0x67e   :  { %v1304_v14 = vpop.f32.mrb[23].mxu0  ;;  %1802 = vmatmul.mubr.msk.f32.vlgmr.msra.gmra.mrb[24].mxu0 %vm103_vm0, %v1314_v12  ;;  %v1316_v16 = vsub.f32 %v1215_v61, %v1792_v13 }
 0x67f   :  { %v1315_v15 = vsub.f32 %v1214_v60, %v1304_v14 }
 0x681   :  { %1804 = vmatprep.mubr.msk.f32.mxu1 %vm103_vm0, %v1315_v15 }
 0x682   :  { %1805 = vmatmul.mubr.msk.f32.vlgmr.msra.gmra.mrb[10].mxu1 %vm103_vm0, %v1316_v16 }
 0x751   :  { %v1803_v30 = vpop.f32.mrb[24].mxu0 }
 0x752   :  { %v1916_v31 = vadd.f32 %v1915_v27, %v1803_v30  ;;  %v1406_v32 = vpop.f32.mrb[25].mxu0 }
 0x753   :  { %v1919_v35 = vadd.f32 %v1918_v29, %v1406_v32 }
 0x754   :  { %v1917_v37 = vadd.f32 %v1916_v31, %v1525_v25 }
 0x755   :  { %v1920_v39 = vadd.f32 %v1919_v35, %v1525_v25  ;;  %v1806_v40 = vpop.f32.mrb[10].mxu1 }
 0x756   :  { %v1437_v41 = vsub.f32 %v1917_v37, %v1530_v34  ;;  %v1922_v42 = vadd.f32 %v1921_v33, %v1806_v40  ;;  %v1416_v43 = vpop.f32.mrb[11].mxu1 }
 0x757   :  { %v1436_v45 = vsub.f32 %v1920_v39, %v1530_v34  ;;  %v1924_v46 = vadd.f32 %v1923_v36, %v1416_v43 }
 0x758   :  { %v1450_v47 = vmul.f32 %v1944_v38, %v1437_v41  ;;  %v1439_v49 = vsub.f32 %v1922_v42, %v1530_v34 }
 0x759   :  { %v1449_v51 = vmul.f32 %v1944_v38, %v1436_v45  ;;  %v1438_v53 = vsub.f32 %v1924_v46, %v1530_v34 }
 0x75a   :  { %v1458_v54 = vmul.f32 %v1454_v44, %v1450_v47  ;;  %v1452_v56 = vmul.f32 %v1944_v38, %v1439_v49 }
 0x75b   :  { %v1457_v58 = vmul.f32 %v1453_v48, %v1449_v51  ;;  %v1451_v60 = vmul.f32 %v1944_v38, %v1438_v53 }
 0x75c   :  { %v1466_v61 = vadd.f32 %v1462_v50, %v1458_v54  ;;  %v1460_v62 = vmul.f32 %v1456_v52, %v1452_v56 }
 0x75d   :  { %v1465_v0 = vadd.f32 %v1461_v55, %v1457_v58  ;;  %v1459_v1 = vmul.f32 %v1455_v57, %v1451_v60 }
 0x75e   :  { %1471 = vst.msk [vmem:[%s2442_s23 + $0x8] sm:$0xff] %vm1469_vm2, %v1466_v61  ;;  %v1468_v2 = vadd.f32 %v1464_v59, %v1460_v62 }
 0x75f   :  { %1470 = vst.msk [vmem:[%s2442_s23] sm:$0xff] %vm1469_vm2, %v1465_v0  ;;  %v1467_v3 = vadd.f32 %v1463_v63, %v1459_v1 }
 0x760   :  { %1473 = vst.msk [vmem:[%s2442_s23 + $0x18] sm:$0xff] %vm1469_vm2, %v1468_v2 }
 0x761   :  { %1472 = vst.msk [vmem:[%s2442_s23 + $0x10] sm:$0xff] %vm1469_vm2, %v1467_v3 }

</bundles_post_ra>
